<compile_context>
chip_gen: v7x
topology: tpu7x:2x2x1
jax: 0.10.0
libtpu: 0.0.40
codegen_flags: <defaults>
</compile_context>

<pallas_src>
import functools
import math

import numpy as np
import jax
import jax.numpy as jnp
from jax.experimental import pallas as pl
from jax.experimental.pallas import tpu as pltpu


# ---------------------------------------------------------------------------
# Pallas kernel: one bidirectional GRU layer, full sequence, both directions.
# ---------------------------------------------------------------------------
def _bigru_layer_kernel(x_ref, lens_ref, wih_ref, whh_ref, bi_ref, bhn_ref,
                        outf_ref, outb_ref, hT_ref, gif_ref, gib_ref,
                        *, T, B, H):
    """Fused fwd+bwd GRU layer with the time loop inside the kernel.

    x_ref    : [T*B, Din]  bf16  (time-major rows: row t*B+b = x[t, b, :])
    lens_ref : [B, H]      int32 (sequence length broadcast over H)
    wih_ref  : [2, Din,3H] bf16  (dir 0 = fwd, 1 = bwd; gate columns r|z|n)
    whh_ref  : [2, H, 3H]  bf16
    bi_ref   : [2, 1, 3H]  f32   (b_ih+b_hh folded for r,z; b_ih only for n)
    bhn_ref  : [2, 1, H]   f32   (b_hh of the n gate)
    outf_ref : [T, B, H]   f32   forward-direction outputs (padded -> 0)
    outb_ref : [T, B, H]   f32   backward-direction outputs (padded -> 0)
    hT_ref   : [2, B, H]   f32   final hidden: fwd then bwd
    gif_ref  : [T*B, 3H]   f32   VMEM scratch: hoisted fwd input projection
    gib_ref  : [T*B, 3H]   f32   VMEM scratch: hoisted bwd input projection
    """
    # ---- Hoisted input projections: one large MXU matmul per direction. ----
    x = x_ref[...]                                             # [T*B, Din] bf16
    gif_ref[...] = (jnp.dot(x, wih_ref[0],
                            preferred_element_type=jnp.float32) + bi_ref[0])
    gib_ref[...] = (jnp.dot(x, wih_ref[1],
                            preferred_element_type=jnp.float32) + bi_ref[1])

    # Hoist loop-invariant loads out of the recurrence.
    whh_f = whh_ref[0]                                         # [H, 3H] bf16
    whh_b = whh_ref[1]
    bhn_f = bhn_ref[0]                                         # [1, H] f32
    bhn_b = bhn_ref[1]
    lens_bh = lens_ref[...]                                    # [B, H] int32

    def gru_step(gi, h, whh, bhn):
        # Only the recurrent dot stays in the loop (fused gates: r|z|n).
        gh = jnp.dot(h.astype(jnp.bfloat16), whh,
                     preferred_element_type=jnp.float32)       # [B, 3H]
        rz = jax.nn.sigmoid(gi[:, :2 * H] + gh[:, :2 * H])
        r = rz[:, :H]
        z = rz[:, H:]
        n = jnp.tanh(gi[:, 2 * H:] + r * (gh[:, 2 * H:] + bhn))
        return (1.0 - z) * n + z * h

    def body(i, carry):
        h_f, h_b = carry
        j = T - 1 - i                                 # backward time index
        m_f = i < lens_bh                             # bool [B, H]
        m_b = j < lens_bh
        gi_f = gif_ref[pl.ds(i * B, B)]               # [B, 3H]
        gi_b = gib_ref[pl.ds(j * B, B)]
        hf_new = gru_step(gi_f, h_f, whh_f, bhn_f)
        hb_new = gru_step(gi_b, h_b, whh_b, bhn_b)
        # Lane-offset-0 stores; padded positions are exactly 0.
        outf_ref[i] = jnp.where(m_f, hf_new, 0.0)
        outb_ref[j] = jnp.where(m_b, hb_new, 0.0)
        # Masked state carry: padded positions keep the previous hidden.
        h_f = jnp.where(m_f, hf_new, h_f)
        h_b = jnp.where(m_b, hb_new, h_b)
        return h_f, h_b

    h0 = jnp.zeros((B, H), jnp.float32)
    unroll = True if T <= 32 else 4
    h_f, h_b = jax.lax.fori_loop(0, T, body, (h0, h0), unroll=unroll)
    hT_ref[0] = h_f
    hT_ref[1] = h_b


def bigru_layer(x, lens_bh, fwd, bwd):
    """x: [T,B,Din] f32, lens_bh: [B,H] int32.

    Returns (out_fwd [T,B,H], out_bwd [T,B,H], h_last [2,B,H])."""
    T, B, Din = x.shape
    H = fwd[1].shape[0]

    def fold_bias(b_ih, b_hh):
        # r,z: b_ih+b_hh folded;  n: keep b_ih with gi and b_hh separate.
        bi = jnp.concatenate([b_ih[:2 * H] + b_hh[:2 * H], b_ih[2 * H:]])
        return bi.reshape(1, 3 * H), b_hh[2 * H:].reshape(1, H)

    w_ih_f, w_hh_f, b_ih_f, b_hh_f = fwd
    w_ih_b, w_hh_b, b_ih_b, b_hh_b = bwd
    bi_f, bhn_f = fold_bias(b_ih_f, b_hh_f)
    bi_b, bhn_b = fold_bias(b_ih_b, b_hh_b)

    wih = jnp.stack([w_ih_f, w_ih_b]).astype(jnp.bfloat16)     # [2, Din, 3H]
    whh = jnp.stack([w_hh_f, w_hh_b]).astype(jnp.bfloat16)     # [2, H, 3H]
    bi = jnp.stack([bi_f, bi_b])                               # [2, 1, 3H] f32
    bhn = jnp.stack([bhn_f, bhn_b])                            # [2, 1, H]  f32

    x2d = x.reshape(T * B, Din).astype(jnp.bfloat16)           # [T*B, Din]

    kernel = functools.partial(_bigru_layer_kernel, T=T, B=B, H=H)

    flops = 4 * T * B * 3 * H * (Din + H)            # 2 dirs * 2*M*N*K (ih+hh)
    transcendentals = 6 * T * B * H                  # 2 dirs * (2 sigm + tanh)
    bytes_accessed = (x2d.size * 2 + (wih.size + whh.size) * 2
                      + (bi.size + bhn.size + lens_bh.size) * 4
                      + (2 * T * B * H + 2 * B * H) * 4)

    out_f, out_b, h_last = pl.pallas_call(
        kernel,
        out_shape=(
            jax.ShapeDtypeStruct((T, B, H), jnp.float32),      # fwd outputs
            jax.ShapeDtypeStruct((T, B, H), jnp.float32),      # bwd outputs
            jax.ShapeDtypeStruct((2, B, H), jnp.float32),      # final hidden
        ),
        scratch_shapes=[
            pltpu.VMEM((T * B, 3 * H), jnp.float32),           # gi fwd
            pltpu.VMEM((T * B, 3 * H), jnp.float32),           # gi bwd
        ],
        cost_estimate=pl.CostEstimate(
            flops=int(flops),
            transcendentals=int(transcendentals),
            bytes_accessed=int(bytes_accessed)),
    )(x2d, lens_bh, wih, whh, bi, bhn)
    return out_f, out_b, h_last


def bidirectional_gru(x, lens, params, hidden_size):
    """x: [T,B,E] sorted by decreasing length. Returns ([T,B,H], [2L,B,H])."""
    T, B, _ = x.shape
    H = hidden_size
    lens = jnp.asarray(lens, jnp.int32)
    lens_bh = jnp.broadcast_to(lens.reshape(B, 1), (B, H)).astype(jnp.int32)

    inp = x
    hiddens = []
    out_f = out_b = None
    for li, layer in enumerate(params):
        out_f, out_b, hT = bigru_layer(inp, lens_bh, layer["fwd"], layer["bwd"])
        hiddens.append(hT[0])          # layer fwd hidden
        hiddens.append(hT[1])          # layer bwd hidden
        if li + 1 < len(params):
            # Direction concat for the next layer input (wrapper-side, cheap).
            inp = jnp.concatenate([out_f, out_b], axis=-1)     # [T, B, 2H]
    # TODO(synk): inter-layer dropout (training mode only) is not applied;
    # this matches eval-mode nn.GRU semantics.
    outputs = out_f + out_b            # module sums fwd + bwd halves
    return outputs, jnp.stack(hiddens, axis=0)


# ---------------------------------------------------------------------------
# SimpleDynamicEncoder forward (glue in plain JAX, recurrence in Pallas).
# ---------------------------------------------------------------------------
def simple_dynamic_encoder_forward(emb_table, gru_params, hidden_size,
                                   input_seqs, input_lens):
    """input_seqs: [T, B] int32; input_lens: numpy array of lengths.
    Returns (outputs [T,B,H], hidden [2L,B,H], embedded_sorted [T,B,E])."""
    embedded = jnp.take(emb_table, input_seqs, axis=0)         # [T, B, E]

    sort_idx = np.argsort(-input_lens)
    unsort_idx = np.argsort(sort_idx)
    lens_sorted = input_lens[sort_idx]
    embedded_sorted = embedded[:, sort_idx, :]                 # [T, B, E]

    outputs, hidden = bidirectional_gru(embedded_sorted, lens_sorted,
                                        gru_params, hidden_size)
    # unsort back to original batch order
    outputs = outputs[:, unsort_idx, :]
    hidden = hidden[:, unsort_idx, :]
    # Note: original module returns the *sorted* embedded, so do we.
    return outputs, hidden, embedded_sorted


# ---------------------------------------------------------------------------
# Deterministic parameter construction (fused-gate layout: W [Din,3H] etc.).
# ---------------------------------------------------------------------------
def make_params(key, input_size, embed_size, hidden_size, n_layers):
    keys = jax.random.split(key, 1 + 8 * n_layers)
    emb_table = jax.random.normal(keys[0], (input_size, embed_size),
                                  jnp.float32) * 0.1
    stdv = 1.0 / math.sqrt(hidden_size)
    gru_params = []
    k = 1
    for layer in range(n_layers):
        d_in = embed_size if layer == 0 else 2 * hidden_size
        layer_p = {}
        for direction in ("fwd", "bwd"):
            w_ih = jax.random.uniform(keys[k + 0], (d_in, 3 * hidden_size),
                                      jnp.float32, -stdv, stdv)
            w_hh = jax.random.uniform(keys[k + 1], (hidden_size, 3 * hidden_size),
                                      jnp.float32, -stdv, stdv)
            b_ih = jax.random.uniform(keys[k + 2], (3 * hidden_size,),
                                      jnp.float32, -stdv, stdv)
            b_hh = jax.random.uniform(keys[k + 3], (3 * hidden_size,),
                                      jnp.float32, -stdv, stdv)
            layer_p[direction] = (w_ih, w_hh, b_ih, b_hh)
            k += 4
        gru_params.append(layer_p)
    return emb_table, gru_params


if __name__ == "__main__":
    # Small shapes consistent with the module: [T, B] token ids.
    input_size = 50     # vocab
    embed_size = 32
    hidden_size = 32
    n_layers = 2
    T, B = 8, 4

    key = jax.random.PRNGKey(0)
    k_param, k_seq = jax.random.split(key)
    emb_table, gru_params = make_params(k_param, input_size, embed_size,
                                        hidden_size, n_layers)

    input_seqs = jax.random.randint(k_seq, (T, B), 0, input_size, jnp.int32)
    input_lens = np.array([8, 3, 5, 6], dtype=np.int32)  # max(lens) == T

    outputs, hidden, embedded = simple_dynamic_encoder_forward(
        emb_table, gru_params, hidden_size, input_seqs, input_lens)

    outputs = jax.block_until_ready(outputs)
    hidden = jax.block_until_ready(hidden)
    embedded = jax.block_until_ready(embedded)

    assert outputs.shape == (T, B, hidden_size)
    assert hidden.shape == (2 * n_layers, B, hidden_size)
    assert embedded.shape == (T, B, embed_size)
    assert bool(jnp.all(jnp.isfinite(outputs)))
    # Packed-sequence check: padded positions must be exactly zero.
    out_np = np.asarray(outputs)
    for b in range(B):
        assert np.allclose(out_np[input_lens[b]:, b, :], 0.0)

    print("KERNEL_OK")
</pallas_src>

<mosaic_0001>
module attributes {stable_mosaic.version = 11 : i64} {
  func.func @_bigru_layer_kernel(%arg0: memref<32x32xbf16, #tpu.memory_space<vmem>>, %arg1: memref<4x32xi32, #tpu.memory_space<vmem>>, %arg2: memref<2x32x96xbf16, #tpu.memory_space<vmem>>, %arg3: memref<2x32x96xbf16, #tpu.memory_space<vmem>>, %arg4: memref<2x1x96xf32, #tpu.memory_space<vmem>>, %arg5: memref<2x1x32xf32, #tpu.memory_space<vmem>>, %arg6: memref<8x4x32xf32, #tpu.memory_space<vmem>>, %arg7: memref<8x4x32xf32, #tpu.memory_space<vmem>>, %arg8: memref<2x4x32xf32, #tpu.memory_space<vmem>>, %arg9: memref<32x96xf32, #tpu.memory_space<vmem>>, %arg10: memref<32x96xf32, #tpu.memory_space<vmem>>) attributes {dimension_semantics = [], scalar_prefetch = 0 : i64, scratch_operands = 2 : i64, tpu.core_type = #tpu.core_type<tc>} {
    %c0 = arith.constant 0 : index
    %c0_0 = arith.constant 0 : index
    %0 = vector.load %arg0[%c0, %c0_0] : memref<32x32xbf16, #tpu.memory_space<vmem>>, vector<32x32xbf16>
    %c0_1 = arith.constant 0 : index
    %c0_2 = arith.constant 0 : index
    %c0_3 = arith.constant 0 : index
    %1 = vector.load %arg2[%c0_1, %c0_2, %c0_3] : memref<2x32x96xbf16, #tpu.memory_space<vmem>>, vector<1x32x96xbf16>
    %2 = vector.shape_cast %1 : vector<1x32x96xbf16> to vector<32x96xbf16>
    %cst = arith.constant dense<0.000000e+00> : vector<32x96xf32>
    %3 = tpu.matmul %0, %2, %cst {dimension_numbers = #tpu.dot_dimension_numbers<[1], [0], [0], [1], [0, 0, 1, 1], [], []>} : vector<32x32xbf16>, vector<32x96xbf16>, vector<32x96xf32> -> vector<32x96xf32>
    %c0_4 = arith.constant 0 : index
    %c0_5 = arith.constant 0 : index
    %c0_6 = arith.constant 0 : index
    %4 = vector.load %arg4[%c0_4, %c0_5, %c0_6] : memref<2x1x96xf32, #tpu.memory_space<vmem>>, vector<1x1x96xf32>
    %5 = vector.shape_cast %4 : vector<1x1x96xf32> to vector<1x96xf32>
    %6 = vector.broadcast %5 : vector<1x96xf32> to vector<32x96xf32>
    %7 = arith.addf %3, %6 : vector<32x96xf32>
    %c0_7 = arith.constant 0 : index
    %c0_8 = arith.constant 0 : index
    %8 = vector.load %arg9[%c0_7, %c0_8] : memref<32x96xf32, #tpu.memory_space<vmem>>, vector<32x96xf32>
    tpu.vector_store %arg9[%c0_7, %c0_8], %7 {strides = array<i32>} : memref<32x96xf32, #tpu.memory_space<vmem>>, vector<32x96xf32>,
    %c1 = arith.constant 1 : index
    %c0_9 = arith.constant 0 : index
    %c0_10 = arith.constant 0 : index
    %9 = vector.load %arg2[%c1, %c0_9, %c0_10] : memref<2x32x96xbf16, #tpu.memory_space<vmem>>, vector<1x32x96xbf16>
    %10 = vector.shape_cast %9 : vector<1x32x96xbf16> to vector<32x96xbf16>
    %cst_11 = arith.constant dense<0.000000e+00> : vector<32x96xf32>
    %11 = tpu.matmul %0, %10, %cst_11 {dimension_numbers = #tpu.dot_dimension_numbers<[1], [0], [0], [1], [0, 0, 1, 1], [], []>} : vector<32x32xbf16>, vector<32x96xbf16>, vector<32x96xf32> -> vector<32x96xf32>
    %c1_12 = arith.constant 1 : index
    %c0_13 = arith.constant 0 : index
    %c0_14 = arith.constant 0 : index
    %12 = vector.load %arg4[%c1_12, %c0_13, %c0_14] : memref<2x1x96xf32, #tpu.memory_space<vmem>>, vector<1x1x96xf32>
    %13 = vector.shape_cast %12 : vector<1x1x96xf32> to vector<1x96xf32>
    %14 = vector.broadcast %13 : vector<1x96xf32> to vector<32x96xf32>
    %15 = arith.addf %11, %14 : vector<32x96xf32>
    %c0_15 = arith.constant 0 : index
    %c0_16 = arith.constant 0 : index
    %16 = vector.load %arg10[%c0_15, %c0_16] : memref<32x96xf32, #tpu.memory_space<vmem>>, vector<32x96xf32>
    tpu.vector_store %arg10[%c0_15, %c0_16], %15 {strides = array<i32>} : memref<32x96xf32, #tpu.memory_space<vmem>>, vector<32x96xf32>,
    %c0_17 = arith.constant 0 : index
    %c0_18 = arith.constant 0 : index
    %c0_19 = arith.constant 0 : index
    %17 = vector.load %arg3[%c0_17, %c0_18, %c0_19] : memref<2x32x96xbf16, #tpu.memory_space<vmem>>, vector<1x32x96xbf16>
    %18 = vector.shape_cast %17 : vector<1x32x96xbf16> to vector<32x96xbf16>
    %c1_20 = arith.constant 1 : index
    %c0_21 = arith.constant 0 : index
    %c0_22 = arith.constant 0 : index
    %19 = vector.load %arg3[%c1_20, %c0_21, %c0_22] : memref<2x32x96xbf16, #tpu.memory_space<vmem>>, vector<1x32x96xbf16>
    %20 = vector.shape_cast %19 : vector<1x32x96xbf16> to vector<32x96xbf16>
    %c0_23 = arith.constant 0 : index
    %c0_24 = arith.constant 0 : index
    %c0_25 = arith.constant 0 : index
    %21 = vector.load %arg5[%c0_23, %c0_24, %c0_25] : memref<2x1x32xf32, #tpu.memory_space<vmem>>, vector<1x1x32xf32>
    %22 = vector.shape_cast %21 : vector<1x1x32xf32> to vector<1x32xf32>
    %c1_26 = arith.constant 1 : index
    %c0_27 = arith.constant 0 : index
    %c0_28 = arith.constant 0 : index
    %23 = vector.load %arg5[%c1_26, %c0_27, %c0_28] : memref<2x1x32xf32, #tpu.memory_space<vmem>>, vector<1x1x32xf32>
    %24 = vector.shape_cast %23 : vector<1x1x32xf32> to vector<1x32xf32>
    %c0_29 = arith.constant 0 : index
    %c0_30 = arith.constant 0 : index
    %25 = vector.load %arg1[%c0_29, %c0_30] : memref<4x32xi32, #tpu.memory_space<vmem>>, vector<4x32xi32>
    %cst_31 = arith.constant 0.000000e+00 : f32
    %26 = vector.broadcast %cst_31 : f32 to vector<4x32xf32>
    %c0_i32 = arith.constant 0 : i32
    %c7_i32 = arith.constant 7 : i32
    %27 = arith.subi %c7_i32, %c0_i32 : i32
    %28 = vector.broadcast %c0_i32 : i32 to vector<4x32xi32>
    %29 = arith.cmpi slt, %28, %25 : vector<4x32xi32>
    %30 = vector.broadcast %27 : i32 to vector<4x32xi32>
    %31 = arith.cmpi slt, %30, %25 : vector<4x32xi32>
    %c4_i32 = arith.constant 4 : i32
    %32 = arith.muli %c0_i32, %c4_i32 : i32
    %33 = arith.index_cast %32 : i32 to index
    %c0_32 = arith.constant 0 : index
    %34 = vector.load %arg9[%33, %c0_32] : memref<32x96xf32, #tpu.memory_space<vmem>>, vector<4x96xf32>
    %c4_i32_33 = arith.constant 4 : i32
    %35 = arith.muli %27, %c4_i32_33 : i32
    %36 = arith.index_cast %35 : i32 to index
    %c0_34 = arith.constant 0 : index
    %37 = vector.load %arg10[%36, %c0_34] : memref<32x96xf32, #tpu.memory_space<vmem>>, vector<4x96xf32>
    %38 = arith.truncf %26 : vector<4x32xf32> to vector<4x32xbf16>
    %cst_35 = arith.constant dense<0.000000e+00> : vector<4x96xf32>
    %39 = tpu.matmul %38, %18, %cst_35 {dimension_numbers = #tpu.dot_dimension_numbers<[1], [0], [0], [1], [0, 0, 1, 1], [], []>} : vector<4x32xbf16>, vector<32x96xbf16>, vector<4x96xf32> -> vector<4x96xf32>
    %40 = vector.extract_strided_slice %34 {offsets = [0, 0], sizes = [4, 64], strides = [1, 1]} : vector<4x96xf32> to vector<4x64xf32>
    %41 = vector.extract_strided_slice %39 {offsets = [0, 0], sizes = [4, 64], strides = [1, 1]} : vector<4x96xf32> to vector<4x64xf32>
    %42 = arith.addf %40, %41 : vector<4x64xf32>
    %43 = arith.negf %42 : vector<4x64xf32>
    %44 = math.exp %43 : vector<4x64xf32>
    %cst_36 = arith.constant 1.000000e+00 : f32
    %45 = vector.broadcast %cst_36 : f32 to vector<4x64xf32>
    %46 = arith.addf %45, %44 : vector<4x64xf32>
    %47 = arith.divf %45, %46 : vector<4x64xf32>
    %48 = vector.extract_strided_slice %47 {offsets = [0, 0], sizes = [4, 32], strides = [1, 1]} : vector<4x64xf32> to vector<4x32xf32>
    %49 = vector.extract_strided_slice %47 {offsets = [0, 32], sizes = [4, 32], strides = [1, 1]} : vector<4x64xf32> to vector<4x32xf32>
    %50 = vector.extract_strided_slice %34 {offsets = [0, 64], sizes = [4, 32], strides = [1, 1]} : vector<4x96xf32> to vector<4x32xf32>
    %51 = vector.extract_strided_slice %39 {offsets = [0, 64], sizes = [4, 32], strides = [1, 1]} : vector<4x96xf32> to vector<4x32xf32>
    %52 = vector.broadcast %22 : vector<1x32xf32> to vector<4x32xf32>
    %53 = arith.addf %51, %52 : vector<4x32xf32>
    %54 = arith.mulf %48, %53 : vector<4x32xf32>
    %55 = arith.addf %50, %54 : vector<4x32xf32>
    %56 = math.tanh %55 : vector<4x32xf32>
    %cst_37 = arith.constant 1.000000e+00 : f32
    %57 = vector.broadcast %cst_37 : f32 to vector<4x32xf32>
    %58 = arith.subf %57, %49 : vector<4x32xf32>
    %59 = arith.mulf %58, %56 : vector<4x32xf32>
    %60 = arith.mulf %49, %26 : vector<4x32xf32>
    %61 = arith.addf %59, %60 : vector<4x32xf32>
    %62 = arith.truncf %26 : vector<4x32xf32> to vector<4x32xbf16>
    %cst_38 = arith.constant dense<0.000000e+00> : vector<4x96xf32>
    %63 = tpu.matmul %62, %20, %cst_38 {dimension_numbers = #tpu.dot_dimension_numbers<[1], [0], [0], [1], [0, 0, 1, 1], [], []>} : vector<4x32xbf16>, vector<32x96xbf16>, vector<4x96xf32> -> vector<4x96xf32>
    %64 = vector.extract_strided_slice %37 {offsets = [0, 0], sizes = [4, 64], strides = [1, 1]} : vector<4x96xf32> to vector<4x64xf32>
    %65 = vector.extract_strided_slice %63 {offsets = [0, 0], sizes = [4, 64], strides = [1, 1]} : vector<4x96xf32> to vector<4x64xf32>
    %66 = arith.addf %64, %65 : vector<4x64xf32>
    %67 = arith.negf %66 : vector<4x64xf32>
    %68 = math.exp %67 : vector<4x64xf32>
    %cst_39 = arith.constant 1.000000e+00 : f32
    %69 = vector.broadcast %cst_39 : f32 to vector<4x64xf32>
    %70 = arith.addf %69, %68 : vector<4x64xf32>
    %71 = arith.divf %69, %70 : vector<4x64xf32>
    %72 = vector.extract_strided_slice %71 {offsets = [0, 0], sizes = [4, 32], strides = [1, 1]} : vector<4x64xf32> to vector<4x32xf32>
    %73 = vector.extract_strided_slice %71 {offsets = [0, 32], sizes = [4, 32], strides = [1, 1]} : vector<4x64xf32> to vector<4x32xf32>
    %74 = vector.extract_strided_slice %37 {offsets = [0, 64], sizes = [4, 32], strides = [1, 1]} : vector<4x96xf32> to vector<4x32xf32>
    %75 = vector.extract_strided_slice %63 {offsets = [0, 64], sizes = [4, 32], strides = [1, 1]} : vector<4x96xf32> to vector<4x32xf32>
    %76 = vector.broadcast %24 : vector<1x32xf32> to vector<4x32xf32>
    %77 = arith.addf %75, %76 : vector<4x32xf32>
    %78 = arith.mulf %72, %77 : vector<4x32xf32>
    %79 = arith.addf %74, %78 : vector<4x32xf32>
    %80 = math.tanh %79 : vector<4x32xf32>
    %cst_40 = arith.constant 1.000000e+00 : f32
    %81 = vector.broadcast %cst_40 : f32 to vector<4x32xf32>
    %82 = arith.subf %81, %73 : vector<4x32xf32>
    %83 = arith.mulf %82, %80 : vector<4x32xf32>
    %84 = arith.mulf %73, %26 : vector<4x32xf32>
    %85 = arith.addf %83, %84 : vector<4x32xf32>
    %cst_41 = arith.constant 0.000000e+00 : f32
    %86 = vector.broadcast %cst_41 : f32 to vector<4x32xf32>
    %87 = arith.select %29, %61, %86 : vector<4x32xi1>, vector<4x32xf32>
    %88 = arith.index_cast %c0_i32 : i32 to index
    %c0_42 = arith.constant 0 : index
    %c0_43 = arith.constant 0 : index
    %89 = vector.load %arg6[%88, %c0_42, %c0_43] : memref<8x4x32xf32, #tpu.memory_space<vmem>>, vector<1x4x32xf32>
    %90 = vector.shape_cast %89 : vector<1x4x32xf32> to vector<4x32xf32>
    %91 = vector.shape_cast %87 : vector<4x32xf32> to vector<1x4x32xf32>
    tpu.vector_store %arg6[%88, %c0_42, %c0_43], %91 {strides = array<i32>} : memref<8x4x32xf32, #tpu.memory_space<vmem>>, vector<1x4x32xf32>,
    %cst_44 = arith.constant 0.000000e+00 : f32
    %92 = vector.broadcast %cst_44 : f32 to vector<4x32xf32>
    %93 = arith.select %31, %85, %92 : vector<4x32xi1>, vector<4x32xf32>
    %94 = arith.index_cast %27 : i32 to index
    %c0_45 = arith.constant 0 : index
    %c0_46 = arith.constant 0 : index
    %95 = vector.load %arg7[%94, %c0_45, %c0_46] : memref<8x4x32xf32, #tpu.memory_space<vmem>>, vector<1x4x32xf32>
    %96 = vector.shape_cast %95 : vector<1x4x32xf32> to vector<4x32xf32>
    %97 = vector.shape_cast %93 : vector<4x32xf32> to vector<1x4x32xf32>
    tpu.vector_store %arg7[%94, %c0_45, %c0_46], %97 {strides = array<i32>} : memref<8x4x32xf32, #tpu.memory_space<vmem>>, vector<1x4x32xf32>,
    %98 = arith.select %29, %61, %26 : vector<4x32xi1>, vector<4x32xf32>
    %99 = arith.select %31, %85, %26 : vector<4x32xi1>, vector<4x32xf32>
    %c1_i32 = arith.constant 1 : i32
    %c7_i32_47 = arith.constant 7 : i32
    %100 = arith.subi %c7_i32_47, %c1_i32 : i32
    %101 = vector.broadcast %c1_i32 : i32 to vector<4x32xi32>
    %102 = arith.cmpi slt, %101, %25 : vector<4x32xi32>
    %103 = vector.broadcast %100 : i32 to vector<4x32xi32>
    %104 = arith.cmpi slt, %103, %25 : vector<4x32xi32>
    %c4_i32_48 = arith.constant 4 : i32
    %105 = arith.muli %c1_i32, %c4_i32_48 : i32
    %106 = arith.index_cast %105 : i32 to index
    %c0_49 = arith.constant 0 : index
    %107 = vector.load %arg9[%106, %c0_49] : memref<32x96xf32, #tpu.memory_space<vmem>>, vector<4x96xf32>
    %c4_i32_50 = arith.constant 4 : i32
    %108 = arith.muli %100, %c4_i32_50 : i32
    %109 = arith.index_cast %108 : i32 to index
    %c0_51 = arith.constant 0 : index
    %110 = vector.load %arg10[%109, %c0_51] : memref<32x96xf32, #tpu.memory_space<vmem>>, vector<4x96xf32>
    %111 = arith.truncf %98 : vector<4x32xf32> to vector<4x32xbf16>
    %cst_52 = arith.constant dense<0.000000e+00> : vector<4x96xf32>
    %112 = tpu.matmul %111, %18, %cst_52 {dimension_numbers = #tpu.dot_dimension_numbers<[1], [0], [0], [1], [0, 0, 1, 1], [], []>} : vector<4x32xbf16>, vector<32x96xbf16>, vector<4x96xf32> -> vector<4x96xf32>
    %113 = vector.extract_strided_slice %107 {offsets = [0, 0], sizes = [4, 64], strides = [1, 1]} : vector<4x96xf32> to vector<4x64xf32>
    %114 = vector.extract_strided_slice %112 {offsets = [0, 0], sizes = [4, 64], strides = [1, 1]} : vector<4x96xf32> to vector<4x64xf32>
    %115 = arith.addf %113, %114 : vector<4x64xf32>
    %116 = arith.negf %115 : vector<4x64xf32>
    %117 = math.exp %116 : vector<4x64xf32>
    %cst_53 = arith.constant 1.000000e+00 : f32
    %118 = vector.broadcast %cst_53 : f32 to vector<4x64xf32>
    %119 = arith.addf %118, %117 : vector<4x64xf32>
    %120 = arith.divf %118, %119 : vector<4x64xf32>
    %121 = vector.extract_strided_slice %120 {offsets = [0, 0], sizes = [4, 32], strides = [1, 1]} : vector<4x64xf32> to vector<4x32xf32>
    %122 = vector.extract_strided_slice %120 {offsets = [0, 32], sizes = [4, 32], strides = [1, 1]} : vector<4x64xf32> to vector<4x32xf32>
    %123 = vector.extract_strided_slice %107 {offsets = [0, 64], sizes = [4, 32], strides = [1, 1]} : vector<4x96xf32> to vector<4x32xf32>
    %124 = vector.extract_strided_slice %112 {offsets = [0, 64], sizes = [4, 32], strides = [1, 1]} : vector<4x96xf32> to vector<4x32xf32>
    %125 = vector.broadcast %22 : vector<1x32xf32> to vector<4x32xf32>
    %126 = arith.addf %124, %125 : vector<4x32xf32>
    %127 = arith.mulf %121, %126 : vector<4x32xf32>
    %128 = arith.addf %123, %127 : vector<4x32xf32>
    %129 = math.tanh %128 : vector<4x32xf32>
    %cst_54 = arith.constant 1.000000e+00 : f32
    %130 = vector.broadcast %cst_54 : f32 to vector<4x32xf32>
    %131 = arith.subf %130, %122 : vector<4x32xf32>
    %132 = arith.mulf %131, %129 : vector<4x32xf32>
    %133 = arith.mulf %122, %98 : vector<4x32xf32>
    %134 = arith.addf %132, %133 : vector<4x32xf32>
    %135 = arith.truncf %99 : vector<4x32xf32> to vector<4x32xbf16>
    %cst_55 = arith.constant dense<0.000000e+00> : vector<4x96xf32>
    %136 = tpu.matmul %135, %20, %cst_55 {dimension_numbers = #tpu.dot_dimension_numbers<[1], [0], [0], [1], [0, 0, 1, 1], [], []>} : vector<4x32xbf16>, vector<32x96xbf16>, vector<4x96xf32> -> vector<4x96xf32>
    %137 = vector.extract_strided_slice %110 {offsets = [0, 0], sizes = [4, 64], strides = [1, 1]} : vector<4x96xf32> to vector<4x64xf32>
    %138 = vector.extract_strided_slice %136 {offsets = [0, 0], sizes = [4, 64], strides = [1, 1]} : vector<4x96xf32> to vector<4x64xf32>
    %139 = arith.addf %137, %138 : vector<4x64xf32>
    %140 = arith.negf %139 : vector<4x64xf32>
    %141 = math.exp %140 : vector<4x64xf32>
    %cst_56 = arith.constant 1.000000e+00 : f32
    %142 = vector.broadcast %cst_56 : f32 to vector<4x64xf32>
    %143 = arith.addf %142, %141 : vector<4x64xf32>
    %144 = arith.divf %142, %143 : vector<4x64xf32>
    %145 = vector.extract_strided_slice %144 {offsets = [0, 0], sizes = [4, 32], strides = [1, 1]} : vector<4x64xf32> to vector<4x32xf32>
    %146 = vector.extract_strided_slice %144 {offsets = [0, 32], sizes = [4, 32], strides = [1, 1]} : vector<4x64xf32> to vector<4x32xf32>
    %147 = vector.extract_strided_slice %110 {offsets = [0, 64], sizes = [4, 32], strides = [1, 1]} : vector<4x96xf32> to vector<4x32xf32>
    %148 = vector.extract_strided_slice %136 {offsets = [0, 64], sizes = [4, 32], strides = [1, 1]} : vector<4x96xf32> to vector<4x32xf32>
    %149 = vector.broadcast %24 : vector<1x32xf32> to vector<4x32xf32>
    %150 = arith.addf %148, %149 : vector<4x32xf32>
    %151 = arith.mulf %145, %150 : vector<4x32xf32>
    %152 = arith.addf %147, %151 : vector<4x32xf32>
    %153 = math.tanh %152 : vector<4x32xf32>
    %cst_57 = arith.constant 1.000000e+00 : f32
    %154 = vector.broadcast %cst_57 : f32 to vector<4x32xf32>
    %155 = arith.subf %154, %146 : vector<4x32xf32>
    %156 = arith.mulf %155, %153 : vector<4x32xf32>
    %157 = arith.mulf %146, %99 : vector<4x32xf32>
    %158 = arith.addf %156, %157 : vector<4x32xf32>
    %cst_58 = arith.constant 0.000000e+00 : f32
    %159 = vector.broadcast %cst_58 : f32 to vector<4x32xf32>
    %160 = arith.select %102, %134, %159 : vector<4x32xi1>, vector<4x32xf32>
    %161 = arith.index_cast %c1_i32 : i32 to index
    %c0_59 = arith.constant 0 : index
    %c0_60 = arith.constant 0 : index
    %162 = vector.load %arg6[%161, %c0_59, %c0_60] : memref<8x4x32xf32, #tpu.memory_space<vmem>>, vector<1x4x32xf32>
    %163 = vector.shape_cast %162 : vector<1x4x32xf32> to vector<4x32xf32>
    %164 = vector.shape_cast %160 : vector<4x32xf32> to vector<1x4x32xf32>
    tpu.vector_store %arg6[%161, %c0_59, %c0_60], %164 {strides = array<i32>} : memref<8x4x32xf32, #tpu.memory_space<vmem>>, vector<1x4x32xf32>,
    %cst_61 = arith.constant 0.000000e+00 : f32
    %165 = vector.broadcast %cst_61 : f32 to vector<4x32xf32>
    %166 = arith.select %104, %158, %165 : vector<4x32xi1>, vector<4x32xf32>
    %167 = arith.index_cast %100 : i32 to index
    %c0_62 = arith.constant 0 : index
    %c0_63 = arith.constant 0 : index
    %168 = vector.load %arg7[%167, %c0_62, %c0_63] : memref<8x4x32xf32, #tpu.memory_space<vmem>>, vector<1x4x32xf32>
    %169 = vector.shape_cast %168 : vector<1x4x32xf32> to vector<4x32xf32>
    %170 = vector.shape_cast %166 : vector<4x32xf32> to vector<1x4x32xf32>
    tpu.vector_store %arg7[%167, %c0_62, %c0_63], %170 {strides = array<i32>} : memref<8x4x32xf32, #tpu.memory_space<vmem>>, vector<1x4x32xf32>,
    %171 = arith.select %102, %134, %98 : vector<4x32xi1>, vector<4x32xf32>
    %172 = arith.select %104, %158, %99 : vector<4x32xi1>, vector<4x32xf32>
    %c2_i32 = arith.constant 2 : i32
    %c7_i32_64 = arith.constant 7 : i32
    %173 = arith.subi %c7_i32_64, %c2_i32 : i32
    %174 = vector.broadcast %c2_i32 : i32 to vector<4x32xi32>
    %175 = arith.cmpi slt, %174, %25 : vector<4x32xi32>
    %176 = vector.broadcast %173 : i32 to vector<4x32xi32>
    %177 = arith.cmpi slt, %176, %25 : vector<4x32xi32>
    %c4_i32_65 = arith.constant 4 : i32
    %178 = arith.muli %c2_i32, %c4_i32_65 : i32
    %179 = arith.index_cast %178 : i32 to index
    %c0_66 = arith.constant 0 : index
    %180 = vector.load %arg9[%179, %c0_66] : memref<32x96xf32, #tpu.memory_space<vmem>>, vector<4x96xf32>
    %c4_i32_67 = arith.constant 4 : i32
    %181 = arith.muli %173, %c4_i32_67 : i32
    %182 = arith.index_cast %181 : i32 to index
    %c0_68 = arith.constant 0 : index
    %183 = vector.load %arg10[%182, %c0_68] : memref<32x96xf32, #tpu.memory_space<vmem>>, vector<4x96xf32>
    %184 = arith.truncf %171 : vector<4x32xf32> to vector<4x32xbf16>
    %cst_69 = arith.constant dense<0.000000e+00> : vector<4x96xf32>
    %185 = tpu.matmul %184, %18, %cst_69 {dimension_numbers = #tpu.dot_dimension_numbers<[1], [0], [0], [1], [0, 0, 1, 1], [], []>} : vector<4x32xbf16>, vector<32x96xbf16>, vector<4x96xf32> -> vector<4x96xf32>
    %186 = vector.extract_strided_slice %180 {offsets = [0, 0], sizes = [4, 64], strides = [1, 1]} : vector<4x96xf32> to vector<4x64xf32>
    %187 = vector.extract_strided_slice %185 {offsets = [0, 0], sizes = [4, 64], strides = [1, 1]} : vector<4x96xf32> to vector<4x64xf32>
    %188 = arith.addf %186, %187 : vector<4x64xf32>
    %189 = arith.negf %188 : vector<4x64xf32>
    %190 = math.exp %189 : vector<4x64xf32>
    %cst_70 = arith.constant 1.000000e+00 : f32
    %191 = vector.broadcast %cst_70 : f32 to vector<4x64xf32>
    %192 = arith.addf %191, %190 : vector<4x64xf32>
    %193 = arith.divf %191, %192 : vector<4x64xf32>
    %194 = vector.extract_strided_slice %193 {offsets = [0, 0], sizes = [4, 32], strides = [1, 1]} : vector<4x64xf32> to vector<4x32xf32>
    %195 = vector.extract_strided_slice %193 {offsets = [0, 32], sizes = [4, 32], strides = [1, 1]} : vector<4x64xf32> to vector<4x32xf32>
    %196 = vector.extract_strided_slice %180 {offsets = [0, 64], sizes = [4, 32], strides = [1, 1]} : vector<4x96xf32> to vector<4x32xf32>
    %197 = vector.extract_strided_slice %185 {offsets = [0, 64], sizes = [4, 32], strides = [1, 1]} : vector<4x96xf32> to vector<4x32xf32>
    %198 = vector.broadcast %22 : vector<1x32xf32> to vector<4x32xf32>
    %199 = arith.addf %197, %198 : vector<4x32xf32>
    %200 = arith.mulf %194, %199 : vector<4x32xf32>
    %201 = arith.addf %196, %200 : vector<4x32xf32>
    %202 = math.tanh %201 : vector<4x32xf32>
    %cst_71 = arith.constant 1.000000e+00 : f32
    %203 = vector.broadcast %cst_71 : f32 to vector<4x32xf32>
    %204 = arith.subf %203, %195 : vector<4x32xf32>
    %205 = arith.mulf %204, %202 : vector<4x32xf32>
    %206 = arith.mulf %195, %171 : vector<4x32xf32>
    %207 = arith.addf %205, %206 : vector<4x32xf32>
    %208 = arith.truncf %172 : vector<4x32xf32> to vector<4x32xbf16>
    %cst_72 = arith.constant dense<0.000000e+00> : vector<4x96xf32>
    %209 = tpu.matmul %208, %20, %cst_72 {dimension_numbers = #tpu.dot_dimension_numbers<[1], [0], [0], [1], [0, 0, 1, 1], [], []>} : vector<4x32xbf16>, vector<32x96xbf16>, vector<4x96xf32> -> vector<4x96xf32>
    %210 = vector.extract_strided_slice %183 {offsets = [0, 0], sizes = [4, 64], strides = [1, 1]} : vector<4x96xf32> to vector<4x64xf32>
    %211 = vector.extract_strided_slice %209 {offsets = [0, 0], sizes = [4, 64], strides = [1, 1]} : vector<4x96xf32> to vector<4x64xf32>
    %212 = arith.addf %210, %211 : vector<4x64xf32>
    %213 = arith.negf %212 : vector<4x64xf32>
    %214 = math.exp %213 : vector<4x64xf32>
    %cst_73 = arith.constant 1.000000e+00 : f32
    %215 = vector.broadcast %cst_73 : f32 to vector<4x64xf32>
    %216 = arith.addf %215, %214 : vector<4x64xf32>
    %217 = arith.divf %215, %216 : vector<4x64xf32>
    %218 = vector.extract_strided_slice %217 {offsets = [0, 0], sizes = [4, 32], strides = [1, 1]} : vector<4x64xf32> to vector<4x32xf32>
    %219 = vector.extract_strided_slice %217 {offsets = [0, 32], sizes = [4, 32], strides = [1, 1]} : vector<4x64xf32> to vector<4x32xf32>
    %220 = vector.extract_strided_slice %183 {offsets = [0, 64], sizes = [4, 32], strides = [1, 1]} : vector<4x96xf32> to vector<4x32xf32>
    %221 = vector.extract_strided_slice %209 {offsets = [0, 64], sizes = [4, 32], strides = [1, 1]} : vector<4x96xf32> to vector<4x32xf32>
    %222 = vector.broadcast %24 : vector<1x32xf32> to vector<4x32xf32>
    %223 = arith.addf %221, %222 : vector<4x32xf32>
    %224 = arith.mulf %218, %223 : vector<4x32xf32>
    %225 = arith.addf %220, %224 : vector<4x32xf32>
    %226 = math.tanh %225 : vector<4x32xf32>
    %cst_74 = arith.constant 1.000000e+00 : f32
    %227 = vector.broadcast %cst_74 : f32 to vector<4x32xf32>
    %228 = arith.subf %227, %219 : vector<4x32xf32>
    %229 = arith.mulf %228, %226 : vector<4x32xf32>
    %230 = arith.mulf %219, %172 : vector<4x32xf32>
    %231 = arith.addf %229, %230 : vector<4x32xf32>
    %cst_75 = arith.constant 0.000000e+00 : f32
    %232 = vector.broadcast %cst_75 : f32 to vector<4x32xf32>
    %233 = arith.select %175, %207, %232 : vector<4x32xi1>, vector<4x32xf32>
    %234 = arith.index_cast %c2_i32 : i32 to index
    %c0_76 = arith.constant 0 : index
    %c0_77 = arith.constant 0 : index
    %235 = vector.load %arg6[%234, %c0_76, %c0_77] : memref<8x4x32xf32, #tpu.memory_space<vmem>>, vector<1x4x32xf32>
    %236 = vector.shape_cast %235 : vector<1x4x32xf32> to vector<4x32xf32>
    %237 = vector.shape_cast %233 : vector<4x32xf32> to vector<1x4x32xf32>
    tpu.vector_store %arg6[%234, %c0_76, %c0_77], %237 {strides = array<i32>} : memref<8x4x32xf32, #tpu.memory_space<vmem>>, vector<1x4x32xf32>,
    %cst_78 = arith.constant 0.000000e+00 : f32
    %238 = vector.broadcast %cst_78 : f32 to vector<4x32xf32>
    %239 = arith.select %177, %231, %238 : vector<4x32xi1>, vector<4x32xf32>
    %240 = arith.index_cast %173 : i32 to index
    %c0_79 = arith.constant 0 : index
    %c0_80 = arith.constant 0 : index
    %241 = vector.load %arg7[%240, %c0_79, %c0_80] : memref<8x4x32xf32, #tpu.memory_space<vmem>>, vector<1x4x32xf32>
    %242 = vector.shape_cast %241 : vector<1x4x32xf32> to vector<4x32xf32>
    %243 = vector.shape_cast %239 : vector<4x32xf32> to vector<1x4x32xf32>
    tpu.vector_store %arg7[%240, %c0_79, %c0_80], %243 {strides = array<i32>} : memref<8x4x32xf32, #tpu.memory_space<vmem>>, vector<1x4x32xf32>,
    %244 = arith.select %175, %207, %171 : vector<4x32xi1>, vector<4x32xf32>
    %245 = arith.select %177, %231, %172 : vector<4x32xi1>, vector<4x32xf32>
    %c3_i32 = arith.constant 3 : i32
    %c7_i32_81 = arith.constant 7 : i32
    %246 = arith.subi %c7_i32_81, %c3_i32 : i32
    %247 = vector.broadcast %c3_i32 : i32 to vector<4x32xi32>
    %248 = arith.cmpi slt, %247, %25 : vector<4x32xi32>
    %249 = vector.broadcast %246 : i32 to vector<4x32xi32>
    %250 = arith.cmpi slt, %249, %25 : vector<4x32xi32>
    %c4_i32_82 = arith.constant 4 : i32
    %251 = arith.muli %c3_i32, %c4_i32_82 : i32
    %252 = arith.index_cast %251 : i32 to index
    %c0_83 = arith.constant 0 : index
    %253 = vector.load %arg9[%252, %c0_83] : memref<32x96xf32, #tpu.memory_space<vmem>>, vector<4x96xf32>
    %c4_i32_84 = arith.constant 4 : i32
    %254 = arith.muli %246, %c4_i32_84 : i32
    %255 = arith.index_cast %254 : i32 to index
    %c0_85 = arith.constant 0 : index
    %256 = vector.load %arg10[%255, %c0_85] : memref<32x96xf32, #tpu.memory_space<vmem>>, vector<4x96xf32>
    %257 = arith.truncf %244 : vector<4x32xf32> to vector<4x32xbf16>
    %cst_86 = arith.constant dense<0.000000e+00> : vector<4x96xf32>
    %258 = tpu.matmul %257, %18, %cst_86 {dimension_numbers = #tpu.dot_dimension_numbers<[1], [0], [0], [1], [0, 0, 1, 1], [], []>} : vector<4x32xbf16>, vector<32x96xbf16>, vector<4x96xf32> -> vector<4x96xf32>
    %259 = vector.extract_strided_slice %253 {offsets = [0, 0], sizes = [4, 64], strides = [1, 1]} : vector<4x96xf32> to vector<4x64xf32>
    %260 = vector.extract_strided_slice %258 {offsets = [0, 0], sizes = [4, 64], strides = [1, 1]} : vector<4x96xf32> to vector<4x64xf32>
    %261 = arith.addf %259, %260 : vector<4x64xf32>
    %262 = arith.negf %261 : vector<4x64xf32>
    %263 = math.exp %262 : vector<4x64xf32>
    %cst_87 = arith.constant 1.000000e+00 : f32
    %264 = vector.broadcast %cst_87 : f32 to vector<4x64xf32>
    %265 = arith.addf %264, %263 : vector<4x64xf32>
    %266 = arith.divf %264, %265 : vector<4x64xf32>
    %267 = vector.extract_strided_slice %266 {offsets = [0, 0], sizes = [4, 32], strides = [1, 1]} : vector<4x64xf32> to vector<4x32xf32>
    %268 = vector.extract_strided_slice %266 {offsets = [0, 32], sizes = [4, 32], strides = [1, 1]} : vector<4x64xf32> to vector<4x32xf32>
    %269 = vector.extract_strided_slice %253 {offsets = [0, 64], sizes = [4, 32], strides = [1, 1]} : vector<4x96xf32> to vector<4x32xf32>
    %270 = vector.extract_strided_slice %258 {offsets = [0, 64], sizes = [4, 32], strides = [1, 1]} : vector<4x96xf32> to vector<4x32xf32>
    %271 = vector.broadcast %22 : vector<1x32xf32> to vector<4x32xf32>
    %272 = arith.addf %270, %271 : vector<4x32xf32>
    %273 = arith.mulf %267, %272 : vector<4x32xf32>
    %274 = arith.addf %269, %273 : vector<4x32xf32>
    %275 = math.tanh %274 : vector<4x32xf32>
    %cst_88 = arith.constant 1.000000e+00 : f32
    %276 = vector.broadcast %cst_88 : f32 to vector<4x32xf32>
    %277 = arith.subf %276, %268 : vector<4x32xf32>
    %278 = arith.mulf %277, %275 : vector<4x32xf32>
    %279 = arith.mulf %268, %244 : vector<4x32xf32>
    %280 = arith.addf %278, %279 : vector<4x32xf32>
    %281 = arith.truncf %245 : vector<4x32xf32> to vector<4x32xbf16>
    %cst_89 = arith.constant dense<0.000000e+00> : vector<4x96xf32>
    %282 = tpu.matmul %281, %20, %cst_89 {dimension_numbers = #tpu.dot_dimension_numbers<[1], [0], [0], [1], [0, 0, 1, 1], [], []>} : vector<4x32xbf16>, vector<32x96xbf16>, vector<4x96xf32> -> vector<4x96xf32>
    %283 = vector.extract_strided_slice %256 {offsets = [0, 0], sizes = [4, 64], strides = [1, 1]} : vector<4x96xf32> to vector<4x64xf32>
    %284 = vector.extract_strided_slice %282 {offsets = [0, 0], sizes = [4, 64], strides = [1, 1]} : vector<4x96xf32> to vector<4x64xf32>
    %285 = arith.addf %283, %284 : vector<4x64xf32>
    %286 = arith.negf %285 : vector<4x64xf32>
    %287 = math.exp %286 : vector<4x64xf32>
    %cst_90 = arith.constant 1.000000e+00 : f32
    %288 = vector.broadcast %cst_90 : f32 to vector<4x64xf32>
    %289 = arith.addf %288, %287 : vector<4x64xf32>
    %290 = arith.divf %288, %289 : vector<4x64xf32>
    %291 = vector.extract_strided_slice %290 {offsets = [0, 0], sizes = [4, 32], strides = [1, 1]} : vector<4x64xf32> to vector<4x32xf32>
    %292 = vector.extract_strided_slice %290 {offsets = [0, 32], sizes = [4, 32], strides = [1, 1]} : vector<4x64xf32> to vector<4x32xf32>
    %293 = vector.extract_strided_slice %256 {offsets = [0, 64], sizes = [4, 32], strides = [1, 1]} : vector<4x96xf32> to vector<4x32xf32>
    %294 = vector.extract_strided_slice %282 {offsets = [0, 64], sizes = [4, 32], strides = [1, 1]} : vector<4x96xf32> to vector<4x32xf32>
    %295 = vector.broadcast %24 : vector<1x32xf32> to vector<4x32xf32>
    %296 = arith.addf %294, %295 : vector<4x32xf32>
    %297 = arith.mulf %291, %296 : vector<4x32xf32>
    %298 = arith.addf %293, %297 : vector<4x32xf32>
    %299 = math.tanh %298 : vector<4x32xf32>
    %cst_91 = arith.constant 1.000000e+00 : f32
    %300 = vector.broadcast %cst_91 : f32 to vector<4x32xf32>
    %301 = arith.subf %300, %292 : vector<4x32xf32>
    %302 = arith.mulf %301, %299 : vector<4x32xf32>
    %303 = arith.mulf %292, %245 : vector<4x32xf32>
    %304 = arith.addf %302, %303 : vector<4x32xf32>
    %cst_92 = arith.constant 0.000000e+00 : f32
    %305 = vector.broadcast %cst_92 : f32 to vector<4x32xf32>
    %306 = arith.select %248, %280, %305 : vector<4x32xi1>, vector<4x32xf32>
    %307 = arith.index_cast %c3_i32 : i32 to index
    %c0_93 = arith.constant 0 : index
    %c0_94 = arith.constant 0 : index
    %308 = vector.load %arg6[%307, %c0_93, %c0_94] : memref<8x4x32xf32, #tpu.memory_space<vmem>>, vector<1x4x32xf32>
    %309 = vector.shape_cast %308 : vector<1x4x32xf32> to vector<4x32xf32>
    %310 = vector.shape_cast %306 : vector<4x32xf32> to vector<1x4x32xf32>
    tpu.vector_store %arg6[%307, %c0_93, %c0_94], %310 {strides = array<i32>} : memref<8x4x32xf32, #tpu.memory_space<vmem>>, vector<1x4x32xf32>,
    %cst_95 = arith.constant 0.000000e+00 : f32
    %311 = vector.broadcast %cst_95 : f32 to vector<4x32xf32>
    %312 = arith.select %250, %304, %311 : vector<4x32xi1>, vector<4x32xf32>
    %313 = arith.index_cast %246 : i32 to index
    %c0_96 = arith.constant 0 : index
    %c0_97 = arith.constant 0 : index
    %314 = vector.load %arg7[%313, %c0_96, %c0_97] : memref<8x4x32xf32, #tpu.memory_space<vmem>>, vector<1x4x32xf32>
    %315 = vector.shape_cast %314 : vector<1x4x32xf32> to vector<4x32xf32>
    %316 = vector.shape_cast %312 : vector<4x32xf32> to vector<1x4x32xf32>
    tpu.vector_store %arg7[%313, %c0_96, %c0_97], %316 {strides = array<i32>} : memref<8x4x32xf32, #tpu.memory_space<vmem>>, vector<1x4x32xf32>,
    %317 = arith.select %248, %280, %244 : vector<4x32xi1>, vector<4x32xf32>
    %318 = arith.select %250, %304, %245 : vector<4x32xi1>, vector<4x32xf32>
    %c4_i32_98 = arith.constant 4 : i32
    %c7_i32_99 = arith.constant 7 : i32
    %319 = arith.subi %c7_i32_99, %c4_i32_98 : i32
    %320 = vector.broadcast %c4_i32_98 : i32 to vector<4x32xi32>
    %321 = arith.cmpi slt, %320, %25 : vector<4x32xi32>
    %322 = vector.broadcast %319 : i32 to vector<4x32xi32>
    %323 = arith.cmpi slt, %322, %25 : vector<4x32xi32>
    %c4_i32_100 = arith.constant 4 : i32
    %324 = arith.muli %c4_i32_98, %c4_i32_100 : i32
    %325 = arith.index_cast %324 : i32 to index
    %c0_101 = arith.constant 0 : index
    %326 = vector.load %arg9[%325, %c0_101] : memref<32x96xf32, #tpu.memory_space<vmem>>, vector<4x96xf32>
    %c4_i32_102 = arith.constant 4 : i32
    %327 = arith.muli %319, %c4_i32_102 : i32
    %328 = arith.index_cast %327 : i32 to index
    %c0_103 = arith.constant 0 : index
    %329 = vector.load %arg10[%328, %c0_103] : memref<32x96xf32, #tpu.memory_space<vmem>>, vector<4x96xf32>
    %330 = arith.truncf %317 : vector<4x32xf32> to vector<4x32xbf16>
    %cst_104 = arith.constant dense<0.000000e+00> : vector<4x96xf32>
    %331 = tpu.matmul %330, %18, %cst_104 {dimension_numbers = #tpu.dot_dimension_numbers<[1], [0], [0], [1], [0, 0, 1, 1], [], []>} : vector<4x32xbf16>, vector<32x96xbf16>, vector<4x96xf32> -> vector<4x96xf32>
    %332 = vector.extract_strided_slice %326 {offsets = [0, 0], sizes = [4, 64], strides = [1, 1]} : vector<4x96xf32> to vector<4x64xf32>
    %333 = vector.extract_strided_slice %331 {offsets = [0, 0], sizes = [4, 64], strides = [1, 1]} : vector<4x96xf32> to vector<4x64xf32>
    %334 = arith.addf %332, %333 : vector<4x64xf32>
    %335 = arith.negf %334 : vector<4x64xf32>
    %336 = math.exp %335 : vector<4x64xf32>
    %cst_105 = arith.constant 1.000000e+00 : f32
    %337 = vector.broadcast %cst_105 : f32 to vector<4x64xf32>
    %338 = arith.addf %337, %336 : vector<4x64xf32>
    %339 = arith.divf %337, %338 : vector<4x64xf32>
    %340 = vector.extract_strided_slice %339 {offsets = [0, 0], sizes = [4, 32], strides = [1, 1]} : vector<4x64xf32> to vector<4x32xf32>
    %341 = vector.extract_strided_slice %339 {offsets = [0, 32], sizes = [4, 32], strides = [1, 1]} : vector<4x64xf32> to vector<4x32xf32>
    %342 = vector.extract_strided_slice %326 {offsets = [0, 64], sizes = [4, 32], strides = [1, 1]} : vector<4x96xf32> to vector<4x32xf32>
    %343 = vector.extract_strided_slice %331 {offsets = [0, 64], sizes = [4, 32], strides = [1, 1]} : vector<4x96xf32> to vector<4x32xf32>
    %344 = vector.broadcast %22 : vector<1x32xf32> to vector<4x32xf32>
    %345 = arith.addf %343, %344 : vector<4x32xf32>
    %346 = arith.mulf %340, %345 : vector<4x32xf32>
    %347 = arith.addf %342, %346 : vector<4x32xf32>
    %348 = math.tanh %347 : vector<4x32xf32>
    %cst_106 = arith.constant 1.000000e+00 : f32
    %349 = vector.broadcast %cst_106 : f32 to vector<4x32xf32>
    %350 = arith.subf %349, %341 : vector<4x32xf32>
    %351 = arith.mulf %350, %348 : vector<4x32xf32>
    %352 = arith.mulf %341, %317 : vector<4x32xf32>
    %353 = arith.addf %351, %352 : vector<4x32xf32>
    %354 = arith.truncf %318 : vector<4x32xf32> to vector<4x32xbf16>
    %cst_107 = arith.constant dense<0.000000e+00> : vector<4x96xf32>
    %355 = tpu.matmul %354, %20, %cst_107 {dimension_numbers = #tpu.dot_dimension_numbers<[1], [0], [0], [1], [0, 0, 1, 1], [], []>} : vector<4x32xbf16>, vector<32x96xbf16>, vector<4x96xf32> -> vector<4x96xf32>
    %356 = vector.extract_strided_slice %329 {offsets = [0, 0], sizes = [4, 64], strides = [1, 1]} : vector<4x96xf32> to vector<4x64xf32>
    %357 = vector.extract_strided_slice %355 {offsets = [0, 0], sizes = [4, 64], strides = [1, 1]} : vector<4x96xf32> to vector<4x64xf32>
    %358 = arith.addf %356, %357 : vector<4x64xf32>
    %359 = arith.negf %358 : vector<4x64xf32>
    %360 = math.exp %359 : vector<4x64xf32>
    %cst_108 = arith.constant 1.000000e+00 : f32
    %361 = vector.broadcast %cst_108 : f32 to vector<4x64xf32>
    %362 = arith.addf %361, %360 : vector<4x64xf32>
    %363 = arith.divf %361, %362 : vector<4x64xf32>
    %364 = vector.extract_strided_slice %363 {offsets = [0, 0], sizes = [4, 32], strides = [1, 1]} : vector<4x64xf32> to vector<4x32xf32>
    %365 = vector.extract_strided_slice %363 {offsets = [0, 32], sizes = [4, 32], strides = [1, 1]} : vector<4x64xf32> to vector<4x32xf32>
    %366 = vector.extract_strided_slice %329 {offsets = [0, 64], sizes = [4, 32], strides = [1, 1]} : vector<4x96xf32> to vector<4x32xf32>
    %367 = vector.extract_strided_slice %355 {offsets = [0, 64], sizes = [4, 32], strides = [1, 1]} : vector<4x96xf32> to vector<4x32xf32>
    %368 = vector.broadcast %24 : vector<1x32xf32> to vector<4x32xf32>
    %369 = arith.addf %367, %368 : vector<4x32xf32>
    %370 = arith.mulf %364, %369 : vector<4x32xf32>
    %371 = arith.addf %366, %370 : vector<4x32xf32>
    %372 = math.tanh %371 : vector<4x32xf32>
    %cst_109 = arith.constant 1.000000e+00 : f32
    %373 = vector.broadcast %cst_109 : f32 to vector<4x32xf32>
    %374 = arith.subf %373, %365 : vector<4x32xf32>
    %375 = arith.mulf %374, %372 : vector<4x32xf32>
    %376 = arith.mulf %365, %318 : vector<4x32xf32>
    %377 = arith.addf %375, %376 : vector<4x32xf32>
    %cst_110 = arith.constant 0.000000e+00 : f32
    %378 = vector.broadcast %cst_110 : f32 to vector<4x32xf32>
    %379 = arith.select %321, %353, %378 : vector<4x32xi1>, vector<4x32xf32>
    %380 = arith.index_cast %c4_i32_98 : i32 to index
    %c0_111 = arith.constant 0 : index
    %c0_112 = arith.constant 0 : index
    %381 = vector.load %arg6[%380, %c0_111, %c0_112] : memref<8x4x32xf32, #tpu.memory_space<vmem>>, vector<1x4x32xf32>
    %382 = vector.shape_cast %381 : vector<1x4x32xf32> to vector<4x32xf32>
    %383 = vector.shape_cast %379 : vector<4x32xf32> to vector<1x4x32xf32>
    tpu.vector_store %arg6[%380, %c0_111, %c0_112], %383 {strides = array<i32>} : memref<8x4x32xf32, #tpu.memory_space<vmem>>, vector<1x4x32xf32>,
    %cst_113 = arith.constant 0.000000e+00 : f32
    %384 = vector.broadcast %cst_113 : f32 to vector<4x32xf32>
    %385 = arith.select %323, %377, %384 : vector<4x32xi1>, vector<4x32xf32>
    %386 = arith.index_cast %319 : i32 to index
    %c0_114 = arith.constant 0 : index
    %c0_115 = arith.constant 0 : index
    %387 = vector.load %arg7[%386, %c0_114, %c0_115] : memref<8x4x32xf32, #tpu.memory_space<vmem>>, vector<1x4x32xf32>
    %388 = vector.shape_cast %387 : vector<1x4x32xf32> to vector<4x32xf32>
    %389 = vector.shape_cast %385 : vector<4x32xf32> to vector<1x4x32xf32>
    tpu.vector_store %arg7[%386, %c0_114, %c0_115], %389 {strides = array<i32>} : memref<8x4x32xf32, #tpu.memory_space<vmem>>, vector<1x4x32xf32>,
    %390 = arith.select %321, %353, %317 : vector<4x32xi1>, vector<4x32xf32>
    %391 = arith.select %323, %377, %318 : vector<4x32xi1>, vector<4x32xf32>
    %c5_i32 = arith.constant 5 : i32
    %c7_i32_116 = arith.constant 7 : i32
    %392 = arith.subi %c7_i32_116, %c5_i32 : i32
    %393 = vector.broadcast %c5_i32 : i32 to vector<4x32xi32>
    %394 = arith.cmpi slt, %393, %25 : vector<4x32xi32>
    %395 = vector.broadcast %392 : i32 to vector<4x32xi32>
    %396 = arith.cmpi slt, %395, %25 : vector<4x32xi32>
    %c4_i32_117 = arith.constant 4 : i32
    %397 = arith.muli %c5_i32, %c4_i32_117 : i32
    %398 = arith.index_cast %397 : i32 to index
    %c0_118 = arith.constant 0 : index
    %399 = vector.load %arg9[%398, %c0_118] : memref<32x96xf32, #tpu.memory_space<vmem>>, vector<4x96xf32>
    %c4_i32_119 = arith.constant 4 : i32
    %400 = arith.muli %392, %c4_i32_119 : i32
    %401 = arith.index_cast %400 : i32 to index
    %c0_120 = arith.constant 0 : index
    %402 = vector.load %arg10[%401, %c0_120] : memref<32x96xf32, #tpu.memory_space<vmem>>, vector<4x96xf32>
    %403 = arith.truncf %390 : vector<4x32xf32> to vector<4x32xbf16>
    %cst_121 = arith.constant dense<0.000000e+00> : vector<4x96xf32>
    %404 = tpu.matmul %403, %18, %cst_121 {dimension_numbers = #tpu.dot_dimension_numbers<[1], [0], [0], [1], [0, 0, 1, 1], [], []>} : vector<4x32xbf16>, vector<32x96xbf16>, vector<4x96xf32> -> vector<4x96xf32>
    %405 = vector.extract_strided_slice %399 {offsets = [0, 0], sizes = [4, 64], strides = [1, 1]} : vector<4x96xf32> to vector<4x64xf32>
    %406 = vector.extract_strided_slice %404 {offsets = [0, 0], sizes = [4, 64], strides = [1, 1]} : vector<4x96xf32> to vector<4x64xf32>
    %407 = arith.addf %405, %406 : vector<4x64xf32>
    %408 = arith.negf %407 : vector<4x64xf32>
    %409 = math.exp %408 : vector<4x64xf32>
    %cst_122 = arith.constant 1.000000e+00 : f32
    %410 = vector.broadcast %cst_122 : f32 to vector<4x64xf32>
    %411 = arith.addf %410, %409 : vector<4x64xf32>
    %412 = arith.divf %410, %411 : vector<4x64xf32>
    %413 = vector.extract_strided_slice %412 {offsets = [0, 0], sizes = [4, 32], strides = [1, 1]} : vector<4x64xf32> to vector<4x32xf32>
    %414 = vector.extract_strided_slice %412 {offsets = [0, 32], sizes = [4, 32], strides = [1, 1]} : vector<4x64xf32> to vector<4x32xf32>
    %415 = vector.extract_strided_slice %399 {offsets = [0, 64], sizes = [4, 32], strides = [1, 1]} : vector<4x96xf32> to vector<4x32xf32>
    %416 = vector.extract_strided_slice %404 {offsets = [0, 64], sizes = [4, 32], strides = [1, 1]} : vector<4x96xf32> to vector<4x32xf32>
    %417 = vector.broadcast %22 : vector<1x32xf32> to vector<4x32xf32>
    %418 = arith.addf %416, %417 : vector<4x32xf32>
    %419 = arith.mulf %413, %418 : vector<4x32xf32>
    %420 = arith.addf %415, %419 : vector<4x32xf32>
    %421 = math.tanh %420 : vector<4x32xf32>
    %cst_123 = arith.constant 1.000000e+00 : f32
    %422 = vector.broadcast %cst_123 : f32 to vector<4x32xf32>
    %423 = arith.subf %422, %414 : vector<4x32xf32>
    %424 = arith.mulf %423, %421 : vector<4x32xf32>
    %425 = arith.mulf %414, %390 : vector<4x32xf32>
    %426 = arith.addf %424, %425 : vector<4x32xf32>
    %427 = arith.truncf %391 : vector<4x32xf32> to vector<4x32xbf16>
    %cst_124 = arith.constant dense<0.000000e+00> : vector<4x96xf32>
    %428 = tpu.matmul %427, %20, %cst_124 {dimension_numbers = #tpu.dot_dimension_numbers<[1], [0], [0], [1], [0, 0, 1, 1], [], []>} : vector<4x32xbf16>, vector<32x96xbf16>, vector<4x96xf32> -> vector<4x96xf32>
    %429 = vector.extract_strided_slice %402 {offsets = [0, 0], sizes = [4, 64], strides = [1, 1]} : vector<4x96xf32> to vector<4x64xf32>
    %430 = vector.extract_strided_slice %428 {offsets = [0, 0], sizes = [4, 64], strides = [1, 1]} : vector<4x96xf32> to vector<4x64xf32>
    %431 = arith.addf %429, %430 : vector<4x64xf32>
    %432 = arith.negf %431 : vector<4x64xf32>
    %433 = math.exp %432 : vector<4x64xf32>
    %cst_125 = arith.constant 1.000000e+00 : f32
    %434 = vector.broadcast %cst_125 : f32 to vector<4x64xf32>
    %435 = arith.addf %434, %433 : vector<4x64xf32>
    %436 = arith.divf %434, %435 : vector<4x64xf32>
    %437 = vector.extract_strided_slice %436 {offsets = [0, 0], sizes = [4, 32], strides = [1, 1]} : vector<4x64xf32> to vector<4x32xf32>
    %438 = vector.extract_strided_slice %436 {offsets = [0, 32], sizes = [4, 32], strides = [1, 1]} : vector<4x64xf32> to vector<4x32xf32>
    %439 = vector.extract_strided_slice %402 {offsets = [0, 64], sizes = [4, 32], strides = [1, 1]} : vector<4x96xf32> to vector<4x32xf32>
    %440 = vector.extract_strided_slice %428 {offsets = [0, 64], sizes = [4, 32], strides = [1, 1]} : vector<4x96xf32> to vector<4x32xf32>
    %441 = vector.broadcast %24 : vector<1x32xf32> to vector<4x32xf32>
    %442 = arith.addf %440, %441 : vector<4x32xf32>
    %443 = arith.mulf %437, %442 : vector<4x32xf32>
    %444 = arith.addf %439, %443 : vector<4x32xf32>
    %445 = math.tanh %444 : vector<4x32xf32>
    %cst_126 = arith.constant 1.000000e+00 : f32
    %446 = vector.broadcast %cst_126 : f32 to vector<4x32xf32>
    %447 = arith.subf %446, %438 : vector<4x32xf32>
    %448 = arith.mulf %447, %445 : vector<4x32xf32>
    %449 = arith.mulf %438, %391 : vector<4x32xf32>
    %450 = arith.addf %448, %449 : vector<4x32xf32>
    %cst_127 = arith.constant 0.000000e+00 : f32
    %451 = vector.broadcast %cst_127 : f32 to vector<4x32xf32>
    %452 = arith.select %394, %426, %451 : vector<4x32xi1>, vector<4x32xf32>
    %453 = arith.index_cast %c5_i32 : i32 to index
    %c0_128 = arith.constant 0 : index
    %c0_129 = arith.constant 0 : index
    %454 = vector.load %arg6[%453, %c0_128, %c0_129] : memref<8x4x32xf32, #tpu.memory_space<vmem>>, vector<1x4x32xf32>
    %455 = vector.shape_cast %454 : vector<1x4x32xf32> to vector<4x32xf32>
    %456 = vector.shape_cast %452 : vector<4x32xf32> to vector<1x4x32xf32>
    tpu.vector_store %arg6[%453, %c0_128, %c0_129], %456 {strides = array<i32>} : memref<8x4x32xf32, #tpu.memory_space<vmem>>, vector<1x4x32xf32>,
    %cst_130 = arith.constant 0.000000e+00 : f32
    %457 = vector.broadcast %cst_130 : f32 to vector<4x32xf32>
    %458 = arith.select %396, %450, %457 : vector<4x32xi1>, vector<4x32xf32>
    %459 = arith.index_cast %392 : i32 to index
    %c0_131 = arith.constant 0 : index
    %c0_132 = arith.constant 0 : index
    %460 = vector.load %arg7[%459, %c0_131, %c0_132] : memref<8x4x32xf32, #tpu.memory_space<vmem>>, vector<1x4x32xf32>
    %461 = vector.shape_cast %460 : vector<1x4x32xf32> to vector<4x32xf32>
    %462 = vector.shape_cast %458 : vector<4x32xf32> to vector<1x4x32xf32>
    tpu.vector_store %arg7[%459, %c0_131, %c0_132], %462 {strides = array<i32>} : memref<8x4x32xf32, #tpu.memory_space<vmem>>, vector<1x4x32xf32>,
    %463 = arith.select %394, %426, %390 : vector<4x32xi1>, vector<4x32xf32>
    %464 = arith.select %396, %450, %391 : vector<4x32xi1>, vector<4x32xf32>
    %c6_i32 = arith.constant 6 : i32
    %c7_i32_133 = arith.constant 7 : i32
    %465 = arith.subi %c7_i32_133, %c6_i32 : i32
    %466 = vector.broadcast %c6_i32 : i32 to vector<4x32xi32>
    %467 = arith.cmpi slt, %466, %25 : vector<4x32xi32>
    %468 = vector.broadcast %465 : i32 to vector<4x32xi32>
    %469 = arith.cmpi slt, %468, %25 : vector<4x32xi32>
    %c4_i32_134 = arith.constant 4 : i32
    %470 = arith.muli %c6_i32, %c4_i32_134 : i32
    %471 = arith.index_cast %470 : i32 to index
    %c0_135 = arith.constant 0 : index
    %472 = vector.load %arg9[%471, %c0_135] : memref<32x96xf32, #tpu.memory_space<vmem>>, vector<4x96xf32>
    %c4_i32_136 = arith.constant 4 : i32
    %473 = arith.muli %465, %c4_i32_136 : i32
    %474 = arith.index_cast %473 : i32 to index
    %c0_137 = arith.constant 0 : index
    %475 = vector.load %arg10[%474, %c0_137] : memref<32x96xf32, #tpu.memory_space<vmem>>, vector<4x96xf32>
    %476 = arith.truncf %463 : vector<4x32xf32> to vector<4x32xbf16>
    %cst_138 = arith.constant dense<0.000000e+00> : vector<4x96xf32>
    %477 = tpu.matmul %476, %18, %cst_138 {dimension_numbers = #tpu.dot_dimension_numbers<[1], [0], [0], [1], [0, 0, 1, 1], [], []>} : vector<4x32xbf16>, vector<32x96xbf16>, vector<4x96xf32> -> vector<4x96xf32>
    %478 = vector.extract_strided_slice %472 {offsets = [0, 0], sizes = [4, 64], strides = [1, 1]} : vector<4x96xf32> to vector<4x64xf32>
    %479 = vector.extract_strided_slice %477 {offsets = [0, 0], sizes = [4, 64], strides = [1, 1]} : vector<4x96xf32> to vector<4x64xf32>
    %480 = arith.addf %478, %479 : vector<4x64xf32>
    %481 = arith.negf %480 : vector<4x64xf32>
    %482 = math.exp %481 : vector<4x64xf32>
    %cst_139 = arith.constant 1.000000e+00 : f32
    %483 = vector.broadcast %cst_139 : f32 to vector<4x64xf32>
    %484 = arith.addf %483, %482 : vector<4x64xf32>
    %485 = arith.divf %483, %484 : vector<4x64xf32>
    %486 = vector.extract_strided_slice %485 {offsets = [0, 0], sizes = [4, 32], strides = [1, 1]} : vector<4x64xf32> to vector<4x32xf32>
    %487 = vector.extract_strided_slice %485 {offsets = [0, 32], sizes = [4, 32], strides = [1, 1]} : vector<4x64xf32> to vector<4x32xf32>
    %488 = vector.extract_strided_slice %472 {offsets = [0, 64], sizes = [4, 32], strides = [1, 1]} : vector<4x96xf32> to vector<4x32xf32>
    %489 = vector.extract_strided_slice %477 {offsets = [0, 64], sizes = [4, 32], strides = [1, 1]} : vector<4x96xf32> to vector<4x32xf32>
    %490 = vector.broadcast %22 : vector<1x32xf32> to vector<4x32xf32>
    %491 = arith.addf %489, %490 : vector<4x32xf32>
    %492 = arith.mulf %486, %491 : vector<4x32xf32>
    %493 = arith.addf %488, %492 : vector<4x32xf32>
    %494 = math.tanh %493 : vector<4x32xf32>
    %cst_140 = arith.constant 1.000000e+00 : f32
    %495 = vector.broadcast %cst_140 : f32 to vector<4x32xf32>
    %496 = arith.subf %495, %487 : vector<4x32xf32>
    %497 = arith.mulf %496, %494 : vector<4x32xf32>
    %498 = arith.mulf %487, %463 : vector<4x32xf32>
    %499 = arith.addf %497, %498 : vector<4x32xf32>
    %500 = arith.truncf %464 : vector<4x32xf32> to vector<4x32xbf16>
    %cst_141 = arith.constant dense<0.000000e+00> : vector<4x96xf32>
    %501 = tpu.matmul %500, %20, %cst_141 {dimension_numbers = #tpu.dot_dimension_numbers<[1], [0], [0], [1], [0, 0, 1, 1], [], []>} : vector<4x32xbf16>, vector<32x96xbf16>, vector<4x96xf32> -> vector<4x96xf32>
    %502 = vector.extract_strided_slice %475 {offsets = [0, 0], sizes = [4, 64], strides = [1, 1]} : vector<4x96xf32> to vector<4x64xf32>
    %503 = vector.extract_strided_slice %501 {offsets = [0, 0], sizes = [4, 64], strides = [1, 1]} : vector<4x96xf32> to vector<4x64xf32>
    %504 = arith.addf %502, %503 : vector<4x64xf32>
    %505 = arith.negf %504 : vector<4x64xf32>
    %506 = math.exp %505 : vector<4x64xf32>
    %cst_142 = arith.constant 1.000000e+00 : f32
    %507 = vector.broadcast %cst_142 : f32 to vector<4x64xf32>
    %508 = arith.addf %507, %506 : vector<4x64xf32>
    %509 = arith.divf %507, %508 : vector<4x64xf32>
    %510 = vector.extract_strided_slice %509 {offsets = [0, 0], sizes = [4, 32], strides = [1, 1]} : vector<4x64xf32> to vector<4x32xf32>
    %511 = vector.extract_strided_slice %509 {offsets = [0, 32], sizes = [4, 32], strides = [1, 1]} : vector<4x64xf32> to vector<4x32xf32>
    %512 = vector.extract_strided_slice %475 {offsets = [0, 64], sizes = [4, 32], strides = [1, 1]} : vector<4x96xf32> to vector<4x32xf32>
    %513 = vector.extract_strided_slice %501 {offsets = [0, 64], sizes = [4, 32], strides = [1, 1]} : vector<4x96xf32> to vector<4x32xf32>
    %514 = vector.broadcast %24 : vector<1x32xf32> to vector<4x32xf32>
    %515 = arith.addf %513, %514 : vector<4x32xf32>
    %516 = arith.mulf %510, %515 : vector<4x32xf32>
    %517 = arith.addf %512, %516 : vector<4x32xf32>
    %518 = math.tanh %517 : vector<4x32xf32>
    %cst_143 = arith.constant 1.000000e+00 : f32
    %519 = vector.broadcast %cst_143 : f32 to vector<4x32xf32>
    %520 = arith.subf %519, %511 : vector<4x32xf32>
    %521 = arith.mulf %520, %518 : vector<4x32xf32>
    %522 = arith.mulf %511, %464 : vector<4x32xf32>
    %523 = arith.addf %521, %522 : vector<4x32xf32>
    %cst_144 = arith.constant 0.000000e+00 : f32
    %524 = vector.broadcast %cst_144 : f32 to vector<4x32xf32>
    %525 = arith.select %467, %499, %524 : vector<4x32xi1>, vector<4x32xf32>
    %526 = arith.index_cast %c6_i32 : i32 to index
    %c0_145 = arith.constant 0 : index
    %c0_146 = arith.constant 0 : index
    %527 = vector.load %arg6[%526, %c0_145, %c0_146] : memref<8x4x32xf32, #tpu.memory_space<vmem>>, vector<1x4x32xf32>
    %528 = vector.shape_cast %527 : vector<1x4x32xf32> to vector<4x32xf32>
    %529 = vector.shape_cast %525 : vector<4x32xf32> to vector<1x4x32xf32>
    tpu.vector_store %arg6[%526, %c0_145, %c0_146], %529 {strides = array<i32>} : memref<8x4x32xf32, #tpu.memory_space<vmem>>, vector<1x4x32xf32>,
    %cst_147 = arith.constant 0.000000e+00 : f32
    %530 = vector.broadcast %cst_147 : f32 to vector<4x32xf32>
    %531 = arith.select %469, %523, %530 : vector<4x32xi1>, vector<4x32xf32>
    %532 = arith.index_cast %465 : i32 to index
    %c0_148 = arith.constant 0 : index
    %c0_149 = arith.constant 0 : index
    %533 = vector.load %arg7[%532, %c0_148, %c0_149] : memref<8x4x32xf32, #tpu.memory_space<vmem>>, vector<1x4x32xf32>
    %534 = vector.shape_cast %533 : vector<1x4x32xf32> to vector<4x32xf32>
    %535 = vector.shape_cast %531 : vector<4x32xf32> to vector<1x4x32xf32>
    tpu.vector_store %arg7[%532, %c0_148, %c0_149], %535 {strides = array<i32>} : memref<8x4x32xf32, #tpu.memory_space<vmem>>, vector<1x4x32xf32>,
    %536 = arith.select %467, %499, %463 : vector<4x32xi1>, vector<4x32xf32>
    %537 = arith.select %469, %523, %464 : vector<4x32xi1>, vector<4x32xf32>
    %c7_i32_150 = arith.constant 7 : i32
    %c7_i32_151 = arith.constant 7 : i32
    %538 = arith.subi %c7_i32_151, %c7_i32_150 : i32
    %539 = vector.broadcast %c7_i32_150 : i32 to vector<4x32xi32>
    %540 = arith.cmpi slt, %539, %25 : vector<4x32xi32>
    %541 = vector.broadcast %538 : i32 to vector<4x32xi32>
    %542 = arith.cmpi slt, %541, %25 : vector<4x32xi32>
    %c4_i32_152 = arith.constant 4 : i32
    %543 = arith.muli %c7_i32_150, %c4_i32_152 : i32
    %544 = arith.index_cast %543 : i32 to index
    %c0_153 = arith.constant 0 : index
    %545 = vector.load %arg9[%544, %c0_153] : memref<32x96xf32, #tpu.memory_space<vmem>>, vector<4x96xf32>
    %c4_i32_154 = arith.constant 4 : i32
    %546 = arith.muli %538, %c4_i32_154 : i32
    %547 = arith.index_cast %546 : i32 to index
    %c0_155 = arith.constant 0 : index
    %548 = vector.load %arg10[%547, %c0_155] : memref<32x96xf32, #tpu.memory_space<vmem>>, vector<4x96xf32>
    %549 = arith.truncf %536 : vector<4x32xf32> to vector<4x32xbf16>
    %cst_156 = arith.constant dense<0.000000e+00> : vector<4x96xf32>
    %550 = tpu.matmul %549, %18, %cst_156 {dimension_numbers = #tpu.dot_dimension_numbers<[1], [0], [0], [1], [0, 0, 1, 1], [], []>} : vector<4x32xbf16>, vector<32x96xbf16>, vector<4x96xf32> -> vector<4x96xf32>
    %551 = vector.extract_strided_slice %545 {offsets = [0, 0], sizes = [4, 64], strides = [1, 1]} : vector<4x96xf32> to vector<4x64xf32>
    %552 = vector.extract_strided_slice %550 {offsets = [0, 0], sizes = [4, 64], strides = [1, 1]} : vector<4x96xf32> to vector<4x64xf32>
    %553 = arith.addf %551, %552 : vector<4x64xf32>
    %554 = arith.negf %553 : vector<4x64xf32>
    %555 = math.exp %554 : vector<4x64xf32>
    %cst_157 = arith.constant 1.000000e+00 : f32
    %556 = vector.broadcast %cst_157 : f32 to vector<4x64xf32>
    %557 = arith.addf %556, %555 : vector<4x64xf32>
    %558 = arith.divf %556, %557 : vector<4x64xf32>
    %559 = vector.extract_strided_slice %558 {offsets = [0, 0], sizes = [4, 32], strides = [1, 1]} : vector<4x64xf32> to vector<4x32xf32>
    %560 = vector.extract_strided_slice %558 {offsets = [0, 32], sizes = [4, 32], strides = [1, 1]} : vector<4x64xf32> to vector<4x32xf32>
    %561 = vector.extract_strided_slice %545 {offsets = [0, 64], sizes = [4, 32], strides = [1, 1]} : vector<4x96xf32> to vector<4x32xf32>
    %562 = vector.extract_strided_slice %550 {offsets = [0, 64], sizes = [4, 32], strides = [1, 1]} : vector<4x96xf32> to vector<4x32xf32>
    %563 = vector.broadcast %22 : vector<1x32xf32> to vector<4x32xf32>
    %564 = arith.addf %562, %563 : vector<4x32xf32>
    %565 = arith.mulf %559, %564 : vector<4x32xf32>
    %566 = arith.addf %561, %565 : vector<4x32xf32>
    %567 = math.tanh %566 : vector<4x32xf32>
    %cst_158 = arith.constant 1.000000e+00 : f32
    %568 = vector.broadcast %cst_158 : f32 to vector<4x32xf32>
    %569 = arith.subf %568, %560 : vector<4x32xf32>
    %570 = arith.mulf %569, %567 : vector<4x32xf32>
    %571 = arith.mulf %560, %536 : vector<4x32xf32>
    %572 = arith.addf %570, %571 : vector<4x32xf32>
    %573 = arith.truncf %537 : vector<4x32xf32> to vector<4x32xbf16>
    %cst_159 = arith.constant dense<0.000000e+00> : vector<4x96xf32>
    %574 = tpu.matmul %573, %20, %cst_159 {dimension_numbers = #tpu.dot_dimension_numbers<[1], [0], [0], [1], [0, 0, 1, 1], [], []>} : vector<4x32xbf16>, vector<32x96xbf16>, vector<4x96xf32> -> vector<4x96xf32>
    %575 = vector.extract_strided_slice %548 {offsets = [0, 0], sizes = [4, 64], strides = [1, 1]} : vector<4x96xf32> to vector<4x64xf32>
    %576 = vector.extract_strided_slice %574 {offsets = [0, 0], sizes = [4, 64], strides = [1, 1]} : vector<4x96xf32> to vector<4x64xf32>
    %577 = arith.addf %575, %576 : vector<4x64xf32>
    %578 = arith.negf %577 : vector<4x64xf32>
    %579 = math.exp %578 : vector<4x64xf32>
    %cst_160 = arith.constant 1.000000e+00 : f32
    %580 = vector.broadcast %cst_160 : f32 to vector<4x64xf32>
    %581 = arith.addf %580, %579 : vector<4x64xf32>
    %582 = arith.divf %580, %581 : vector<4x64xf32>
    %583 = vector.extract_strided_slice %582 {offsets = [0, 0], sizes = [4, 32], strides = [1, 1]} : vector<4x64xf32> to vector<4x32xf32>
    %584 = vector.extract_strided_slice %582 {offsets = [0, 32], sizes = [4, 32], strides = [1, 1]} : vector<4x64xf32> to vector<4x32xf32>
    %585 = vector.extract_strided_slice %548 {offsets = [0, 64], sizes = [4, 32], strides = [1, 1]} : vector<4x96xf32> to vector<4x32xf32>
    %586 = vector.extract_strided_slice %574 {offsets = [0, 64], sizes = [4, 32], strides = [1, 1]} : vector<4x96xf32> to vector<4x32xf32>
    %587 = vector.broadcast %24 : vector<1x32xf32> to vector<4x32xf32>
    %588 = arith.addf %586, %587 : vector<4x32xf32>
    %589 = arith.mulf %583, %588 : vector<4x32xf32>
    %590 = arith.addf %585, %589 : vector<4x32xf32>
    %591 = math.tanh %590 : vector<4x32xf32>
    %cst_161 = arith.constant 1.000000e+00 : f32
    %592 = vector.broadcast %cst_161 : f32 to vector<4x32xf32>
    %593 = arith.subf %592, %584 : vector<4x32xf32>
    %594 = arith.mulf %593, %591 : vector<4x32xf32>
    %595 = arith.mulf %584, %537 : vector<4x32xf32>
    %596 = arith.addf %594, %595 : vector<4x32xf32>
    %cst_162 = arith.constant 0.000000e+00 : f32
    %597 = vector.broadcast %cst_162 : f32 to vector<4x32xf32>
    %598 = arith.select %540, %572, %597 : vector<4x32xi1>, vector<4x32xf32>
    %599 = arith.index_cast %c7_i32_150 : i32 to index
    %c0_163 = arith.constant 0 : index
    %c0_164 = arith.constant 0 : index
    %600 = vector.load %arg6[%599, %c0_163, %c0_164] : memref<8x4x32xf32, #tpu.memory_space<vmem>>, vector<1x4x32xf32>
    %601 = vector.shape_cast %600 : vector<1x4x32xf32> to vector<4x32xf32>
    %602 = vector.shape_cast %598 : vector<4x32xf32> to vector<1x4x32xf32>
    tpu.vector_store %arg6[%599, %c0_163, %c0_164], %602 {strides = array<i32>} : memref<8x4x32xf32, #tpu.memory_space<vmem>>, vector<1x4x32xf32>,
    %cst_165 = arith.constant 0.000000e+00 : f32
    %603 = vector.broadcast %cst_165 : f32 to vector<4x32xf32>
    %604 = arith.select %542, %596, %603 : vector<4x32xi1>, vector<4x32xf32>
    %605 = arith.index_cast %538 : i32 to index
    %c0_166 = arith.constant 0 : index
    %c0_167 = arith.constant 0 : index
    %606 = vector.load %arg7[%605, %c0_166, %c0_167] : memref<8x4x32xf32, #tpu.memory_space<vmem>>, vector<1x4x32xf32>
    %607 = vector.shape_cast %606 : vector<1x4x32xf32> to vector<4x32xf32>
    %608 = vector.shape_cast %604 : vector<4x32xf32> to vector<1x4x32xf32>
    tpu.vector_store %arg7[%605, %c0_166, %c0_167], %608 {strides = array<i32>} : memref<8x4x32xf32, #tpu.memory_space<vmem>>, vector<1x4x32xf32>,
    %609 = arith.select %540, %572, %536 : vector<4x32xi1>, vector<4x32xf32>
    %610 = arith.select %542, %596, %537 : vector<4x32xi1>, vector<4x32xf32>
    %c8_i32 = arith.constant 8 : i32
    %c0_168 = arith.constant 0 : index
    %c0_169 = arith.constant 0 : index
    %c0_170 = arith.constant 0 : index
    %611 = vector.load %arg8[%c0_168, %c0_169, %c0_170] : memref<2x4x32xf32, #tpu.memory_space<vmem>>, vector<1x4x32xf32>
    %612 = vector.shape_cast %611 : vector<1x4x32xf32> to vector<4x32xf32>
    %613 = vector.shape_cast %609 : vector<4x32xf32> to vector<1x4x32xf32>
    tpu.vector_store %arg8[%c0_168, %c0_169, %c0_170], %613 {strides = array<i32>} : memref<2x4x32xf32, #tpu.memory_space<vmem>>, vector<1x4x32xf32>,
    %c1_171 = arith.constant 1 : index
    %c0_172 = arith.constant 0 : index
    %c0_173 = arith.constant 0 : index
    %614 = vector.load %arg8[%c1_171, %c0_172, %c0_173] : memref<2x4x32xf32, #tpu.memory_space<vmem>>, vector<1x4x32xf32>
    %615 = vector.shape_cast %614 : vector<1x4x32xf32> to vector<4x32xf32>
    %616 = vector.shape_cast %610 : vector<4x32xf32> to vector<1x4x32xf32>
    tpu.vector_store %arg8[%c1_171, %c0_172, %c0_173], %616 {strides = array<i32>} : memref<2x4x32xf32, #tpu.memory_space<vmem>>, vector<1x4x32xf32>,
    return
  }
}

</mosaic_0001>

<bundles_post_ra>
// kernel: tpu_custom_call.1
= control target key start
LH: loop header
LB: loop body
LE: loop exit
PB: predicated region body
PF: predicated region fallthrough
CT: control target
= control target key end

     0   :  { %14 = vsyncpa [#allocation5], 0  ;;  %s2832_s0 = inlined_call_operand.hbm [shape: bf16[32,32], index: 0, kind: input, shape index: {}]   ;;  %s2833_s1 = inlined_call_operand.hbm [shape: s32[4,32], index: 1, kind: input, shape index: {}]   ;;  %s2834_s2 = inlined_call_operand.hbm [shape: bf16[2,32,96], index: 2, kind: input, shape index: {}]   ;;  %s2835_s3 = inlined_call_operand.hbm [shape: bf16[2,32,96], index: 3, kind: input, shape index: {}]   ;;  %s2836_s4 = inlined_call_operand.vmem [shape: f32[2,1,96], index: 4, kind: input, shape index: {}]   ;;  %s2837_s5 = inlined_call_operand.vmem [shape: f32[2,1,32], index: 5, kind: input, shape index: {}]   ;;  %s2838_s6 = inlined_call_operand.hbm [shape: f32[8,4,32], index: 6, kind: output, shape index: {0}]   ;;  %s2839_s7 = inlined_call_operand.hbm [shape: f32[8,4,32], index: 7, kind: output, shape index: {1}]   ;;  %s2840_s8 = inlined_call_operand.hbm [shape: f32[2,4,32], index: 8, kind: output, shape index: {2}]  }
   0x1   :  { %15 = vsyncpa [#allocation8], 0 }
   0x2   :  { %16 = vsyncpa [#allocation11], 0 }
   0x3   :  { %17 = vsyncpa [#allocation6], 0 }
   0x4   :  { %18 = vsyncpa [#allocation14], 0  ;;  %s2238_s27 = smov [#allocation7]   ;;  %s2239_s29 = smov [#allocation4]  }
   0x5   :  { %s37_s28 = sshll.u32 %s2238_s27, 4  ;;  %s24_s30 = sshll.u32 %s2239_s29, 4  ;;  %s38_s28 = int_to_ptr.vmem [resolvable:$true] %s37_s28  ;;  %s2297_s30 = int_to_ptr.vmem [resolvable:$true] %s24_s30 }
   0x6   :  { %s2074_s11 = scalar_lea.hbm %s2833_s1, 64 }
   0x7   :  { %p2075_p0 = scmp.ne.s32.totalorder %s2833_s1, %s2074_s11  ;;  %p2078_p1 = scmp.lt.u32.totalorder %s2074_s11, %s2833_s1 }
   0x9   :  { %p2080_p2 = pnand %p2078_p1, %p2075_p0 }
   0xb   :  { %2083 = shalt.err (!%p2080_p2)
}
   0xc   :  { %s2084_s16 = scalar_lea.vmem %s38_s28, 64  ;;  %p2089_p4 = scmp.lt.s32.totalorder %s38_s28, %s38_s28 }
   0xd   :  { %p2085_p3 = scmp.ne.s32.totalorder %s38_s28, %s2084_s16  ;;  %p2090_p5 = scmp.lt.s32.totalorder %s2084_s16, %s2084_s16 }
   0xf   :  { %p2091_p6 = por %p2090_p5, %p2089_p4 }
  0x11   :  { %p2092_p7 = pnand %p2091_p6, %p2085_p3 }
  0x13   :  { %2095 = shalt.err (!%p2092_p7)
}
  0x14   :  { %40 = dma.hbm_to_vmem [thread:$0]  %s2833_s1, 64, %s38_s28, [#allocation8]  }
  0x15   :  { %s2096_s21 = scalar_lea.hbm %s2832_s0, 256 }
  0x16   :  { %p2097_p8 = scmp.ne.s32.totalorder %s2832_s0, %s2096_s21  ;;  %p2100_p9 = scmp.lt.u32.totalorder %s2096_s21, %s2832_s0 }
  0x18   :  { %p2102_p10 = pnand %p2100_p9, %p2097_p8 }
  0x1a   :  { %2105 = shalt.err (!%p2102_p10)
}
  0x1b   :  { %s2106_s26 = scalar_lea.vmem %s2297_s30, 256  ;;  %p2111_p12 = scmp.lt.s32.totalorder %s2297_s30, %s2297_s30 }
  0x1c   :  { %p2107_p11 = scmp.ne.s32.totalorder %s2297_s30, %s2106_s26  ;;  %p2112_p13 = scmp.lt.s32.totalorder %s2106_s26, %s2106_s26 }
  0x1e   :  { %p2113_p0 = por %p2112_p13, %p2111_p12 }
  0x20   :  { %p2114_p1 = pnand %p2113_p0, %p2107_p11 }
  0x22   :  { %2117 = shalt.err (!%p2114_p1)
}
  0x23   :  { %s2240_s1 = smov 64   ;;  %s2241_s27 = smov 4  }
  0x24   :  { %30 = dma.hbm_to_vmem [thread:$0]  %s2832_s0, 256, %s2297_s30, [#allocation5], %s2240_s1, %s2240_s1, %s2241_s27  }
  0x25   :  { %s2242_s9 = smov [#allocation9]   ;;  %s2243_s11 = smov [#allocation10]  }
  0x26   :  { %s46_s10 = sshll.u32 %s2242_s9, 4  ;;  %s58_s12 = sshll.u32 %s2243_s11, 4  ;;  %s47_s10 = int_to_ptr.vmem [resolvable:$true] %s46_s10  ;;  %s2331_s12 = int_to_ptr.vmem [resolvable:$true] %s58_s12 }
  0x27   :  { %s2118_s15 = scalar_lea.hbm %s2834_s2, 512 }
  0x28   :  { %p2119_p2 = scmp.ne.s32.totalorder %s2834_s2, %s2118_s15  ;;  %p2122_p3 = scmp.lt.u32.totalorder %s2118_s15, %s2834_s2 }
  0x2a   :  { %p2124_p4 = pnand %p2122_p3, %p2119_p2 }
  0x2c   :  { %2127 = shalt.err (!%p2124_p4)
}
  0x2d   :  { %s2128_s0 = scalar_lea.vmem %s47_s10, 512  ;;  %p2133_p6 = scmp.lt.s32.totalorder %s47_s10, %s47_s10 }
  0x2e   :  { %p2129_p5 = scmp.ne.s32.totalorder %s47_s10, %s2128_s0  ;;  %p2134_p7 = scmp.lt.s32.totalorder %s2128_s0, %s2128_s0 }
  0x30   :  { %p2135_p8 = por %p2134_p7, %p2133_p6 }
  0x32   :  { %p2136_p9 = pnand %p2135_p8, %p2129_p5 }
  0x34   :  { %2139 = shalt.err (!%p2136_p9)
}
  0x35   :  { %52 = dma.hbm_to_vmem [thread:$0]  %s2834_s2, 512, %s47_s10, [#allocation8], %s2240_s1, %s2240_s1, %s2241_s27  }
  0x36   :  { %s2140_s23 = scalar_lea.hbm %s2835_s3, 512 }
  0x37   :  { %p2141_p10 = scmp.ne.s32.totalorder %s2835_s3, %s2140_s23  ;;  %p2144_p11 = scmp.lt.u32.totalorder %s2140_s23, %s2835_s3 }
  0x39   :  { %p2146_p12 = pnand %p2144_p11, %p2141_p10 }
  0x3b   :  { %2149 = shalt.err (!%p2146_p12)
}
  0x3c   :  { %s2150_s29 = scalar_lea.vmem %s2331_s12, 512  ;;  %p2155_p0 = scmp.lt.s32.totalorder %s2331_s12, %s2331_s12 }
  0x3d   :  { %p2151_p13 = scmp.ne.s32.totalorder %s2331_s12, %s2150_s29  ;;  %p2156_p1 = scmp.lt.s32.totalorder %s2150_s29, %s2150_s29 }
  0x3f   :  { %p2157_p2 = por %p2156_p1, %p2155_p0 }
  0x41   :  { %p2158_p3 = pnand %p2157_p2, %p2151_p13 }
  0x43   :  { %2161 = shalt.err (!%p2158_p3)
}
  0x44   :  { %64 = dma.hbm_to_vmem [thread:$0]  %s2835_s3, 512, %s2331_s12, [#allocation11], %s2240_s1, %s2240_s1, %s2241_s27  }
  0x45   :  { %2228 = dma.done.wait [#allocation5], 256  }
  0x46   :  { %2229 = vsyncadd [#allocation5], 4294967040 }
  0x47   :  { %2230 = dma.done.wait [#allocation8], 576  }
  0x48   :  { %2231 = vsyncadd [#allocation8], 4294966720 }
  0x49   :  { %2232 = dma.done.wait [#allocation11], 512  }
  0x4a   :  { %2233 = vsyncadd [#allocation11], 4294966784  ;;  %v1964_v0 = vld [vmem:[#allocation9 + $0x10] sm:$0xff]   ;;  %v1965_v1 = vld [vmem:[#allocation9] sm:$0xff]   ;;  %vm119_vm0 = vcmask 261120   ;;  %v2244_v7 = vmov 0.0  }
  0x4b   :  { %1814 = vmatprep.subr.bf16.mxu1 %v1964_v0  ;;  %v1966_v2 = vld [vmem:[#allocation9 + $0x18] sm:$0xff]   ;;  %1806 = vmatprep.subr.bf16.mxu0 %v1965_v1  ;;  %v1967_v3 = vld [vmem:[#allocation9 + $0x8] sm:$0xff]   ;;  %v2370_v6 = vld [vmem:[#allocation10 + $0x10] sm:$0xff]   ;;  %vm2245_vm1 = vmmov 0   ;;  %v2246_v13 = vmov 0   ;;  %vm175_vm2 = vcmask 785408  }
  0x4c   :  { %1815 = vmatpush3.bf16.msra.mxu1 %v1964_v0  ;;  %1807 = vmatpush3.bf16.msra.mxu0 %v1965_v1  ;;  %v1968_v4 = vld [vmem:[#allocation4] sm:$0xff]   ;;  %v1969_v5 = vld [vmem:[#allocation4 + $0x8] sm:$0xff]   ;;  %v2373_v8 = vld [vmem:[#allocation10] sm:$0xff]   ;;  %vm457_vm4 = vcmask 257024   ;;  %s2248_s16 = smov 32   ;;  %s2249_s17 = smov [#allocation13]  }
  0x4d   :  { %1816 = vmatprep.subr.bf16.mxu1 %v1966_v2  ;;  %1808 = vmatprep.subr.bf16.mxu0 %v1967_v3  ;;  %v2379_v9 = vld [vmem:[#allocation10 + $0x18] sm:$0xff]   ;;  %v1721_v10 = vld [vmem:[%s2837_s5 + $0x1] ss:$0 sm:$0xff]  ;;  %v1717_v12 = vld [vmem:[%s2837_s5] ss:$0 sm:$0xff]  ;;  %s1667_s18 = sshll.u32 %s2249_s17, 4  ;;  %s1668_s18 = int_to_ptr.vmem [resolvable:$true] %s1667_s18 }
  0x4e   :  { %1818 = vmatprep.mubr.msk.bf16.mxu1 %vm119_vm0, %v1968_v4  ;;  %1810 = vmatprep.mubr.msk.bf16.mxu0 %vm119_vm0, %v1968_v4  ;;  %v2386_v11 = vld [vmem:[#allocation10 + $0x8] sm:$0xff]   ;;  %s2250_s19 = smov [#allocation12]   ;;  %s2251_s30 = smov [#allocation15]  }
  0x4f   :  { %429 = vrot.lane.b32.xlu0 %v1721_v10, %s2240_s1  ;;  %v1708_v14 = vld [vmem:[%s2836_s4 + $0x1] ss:$0 sm:$0xff]  ;;  %v1700_v16 = vld [vmem:[%s2836_s4] ss:$0 sm:$0xff]  ;;  %s2247_s4 = smov 96   ;;  %s1655_s0 = sshll.u32 %s2250_s19, 4  ;;  %s1656_s0 = int_to_ptr.vmem [resolvable:$true] %s1655_s0 }
  0x50   :  { %1817 = vmatpush3.bf16.msra.mxu1 %v1966_v2  ;;  %1809 = vmatpush3.bf16.msra.mxu0 %v1967_v3  ;;  %s1679_s20 = sshll.u32 %s2251_s30, 4  ;;  %s2162_s21 = scalar_lea.vmem %s1668_s18, 512  ;;  %s2793_s20 = int_to_ptr.vmem [resolvable:$true] %s1679_s20 }
  0x51   :  { %1830 = vmatprep.subr.bf16.mxu1 %v2244_v7  ;;  %1822 = vmatprep.subr.bf16.mxu0 %v2244_v7  ;;  %p2163_p4 = scmp.ne.s32.totalorder %s1668_s18, %s2162_s21  ;;  %p2167_p5 = scmp.lt.s32.totalorder %s1668_s18, %s1668_s18 }
  0x52   :  { %p2168_p6 = scmp.lt.s32.totalorder %s2162_s21, %s2162_s21 }
  0x53   :  { %1819 = vmatmul.mubr.msk.bf16.vlgmr.msra.gmra.mrb[0].mxu1 %vm119_vm0, %v1969_v5  ;;  %1811 = vmatmul.mubr.msk.bf16.vlgmr.msra.gmra.mrb[0].mxu0 %vm119_vm0, %v1969_v5 }
  0x54   :  { %1831 = vmatpush3.bf16.msra.mxu1 %v2370_v6  ;;  %1823 = vmatpush3.bf16.msra.mxu0 %v2373_v8  ;;  %p2169_p7 = por %p2168_p6, %p2167_p5 }
  0x55   :  { %1832 = vmatprep.subr.bf16.mxu1 %v2244_v7  ;;  %1824 = vmatprep.subr.bf16.mxu0 %v2244_v7 }
  0x56   :  { %1834 = vmatprep.mubr.msk.bf16.mxu1 %vm2245_vm1, %v2244_v7  ;;  %1826 = vmatprep.mubr.msk.bf16.mxu0 %vm2245_vm1, %v2244_v7  ;;  %p2170_p8 = pnand %p2169_p7, %p2163_p4 }
  0x57   :  { %342 = vrot.lane.b32.xlu0 %v1717_v12, %s2240_s1 }
  0x58   :  { %1833 = vmatpush3.bf16.msra.mxu1 %v2379_v9  ;;  %1825 = vmatpush3.bf16.msra.mxu0 %v2386_v11 }
  0x59   :  { %1846 = vmatprep.subr.bf16.mxu1 %v2244_v7  ;;  %1838 = vmatprep.subr.bf16.mxu0 %v2244_v7 }
  0x5b   :  { %1835 = vmatmul.mubr.bf16.vlgmr.msra.gmra.mrb[4].mxu1 %v2246_v13  ;;  %1827 = vmatmul.mubr.bf16.vlgmr.msra.gmra.mrb[4].mxu0 %v2246_v13 }
  0x5c   :  { %1847 = vmatpush3.bf16.msra.mxu1 %v2370_v6  ;;  %1839 = vmatpush3.bf16.msra.mxu0 %v2373_v8 }
  0x5d   :  { %1848 = vmatprep.subr.bf16.mxu1 %v2244_v7  ;;  %1850 = vmatprep.mubr.msk.bf16.mxu1 %vm2245_vm1, %v2244_v7 }
  0x5e   :  { %1840 = vmatprep.subr.bf16.mxu0 %v2244_v7  ;;  %1842 = vmatprep.mubr.msk.bf16.mxu0 %vm2245_vm1, %v2244_v7 }
  0x60   :  { %1849 = vmatpush3.bf16.msra.mxu1 %v2379_v9  ;;  %1841 = vmatpush3.bf16.msra.mxu0 %v2386_v11 }
  0x61   :  { %1862 = vmatprep.subr.bf16.mxu1 %v2244_v7  ;;  %1854 = vmatprep.subr.bf16.mxu0 %v2244_v7 }
  0xc1   :  { %v2420_v17 = vpop.permute.xlu0 %429 }
  0xc9   :  { %v2430_v34 = vpop.permute.xlu0 %342 }
 0x126   :  { %v1820_v15 = vpop.f32.mrb[0].mxu1  ;;  %v1812_v20 = vpop.f32.mrb[0].mxu0 }
 0x127   :  { %v248_v18 = vadd.f32 %v1820_v15, %v1708_v14  ;;  %v239_v19 = vpop.f32.mrb[1].mxu1  ;;  %v169_v22 = vadd.f32 %v1812_v20, %v1700_v16  ;;  %v160_v24 = vpop.f32.mrb[1].mxu0 }
 0x128   :  { %v240_v21 = vadd.f32 %v1708_v14, %v239_v19  ;;  %v1821_v23 = vpop.f32.mrb[2].mxu1  ;;  %v161_v26 = vadd.f32 %v1700_v16, %v160_v24  ;;  %v1813_v28 = vpop.f32.mrb[2].mxu0 }
 0x129   :  { %256 = vst.msk [vmem:[#allocation3 + $0x10] sm:$0xff] %vm175_vm2, %v248_v18  ;;  %v251_v25 = vadd.f32 %v1821_v23, %v1708_v14  ;;  %v242_v27 = vpop.f32.mrb[3].mxu1  ;;  %178 = vst.msk [vmem:[#allocation2 + $0x10] sm:$0xff] %vm175_vm2, %v169_v22  ;;  %v172_v30 = vadd.f32 %v1813_v28, %v1700_v16  ;;  %v163_v31 = vpop.f32.mrb[3].mxu0  ;;  %v2442_v18 = vld [vmem:[#allocation7] sm:$0xf] }
 0x12a   :  { %254 = vst.msk [vmem:[#allocation3] sm:$0xff] %vm175_vm2, %v240_v21  ;;  %v243_v29 = vadd.f32 %v1708_v14, %v242_v27  ;;  %176 = vst.msk [vmem:[#allocation2] sm:$0xff] %vm175_vm2, %v161_v26  ;;  %v164_v32 = vadd.f32 %v1700_v16, %v163_v31  ;;  %vm272_vm3 = vcmp.gt.s32.totalorder %v2442_v18, 7  ;;  %vm271_vm5 = vcmp.gt.s32.totalorder %v2442_v18, 0 }
 0x12b   :  { %257 = vst.msk [vmem:[#allocation3 + $0x18] sm:$0xff] %vm175_vm2, %v251_v25  ;;  %179 = vst.msk [vmem:[#allocation2 + $0x18] sm:$0xff] %vm175_vm2, %v172_v30  ;;  %vm467_vm6 = vcmp.gt.s32.totalorder %v2442_v18, 6  ;;  %vm466_vm7 = vcmp.gt.s32.totalorder %v2442_v18, 1  ;;  %vm637_vm8 = vcmp.gt.s32.totalorder %v2442_v18, 5  ;;  %vm636_vm9 = vcmp.gt.s32.totalorder %v2442_v18, 2 }
 0x12c   :  { %255 = vst.msk [vmem:[#allocation3 + $0x8] sm:$0xff] %vm175_vm2, %v243_v29  ;;  %177 = vst.msk [vmem:[#allocation2 + $0x8] sm:$0xff] %vm175_vm2, %v164_v32  ;;  %vm807_vm10 = vcmp.gt.s32.totalorder %v2442_v18, 4  ;;  %vm806_vm11 = vcmp.gt.s32.totalorder %v2442_v18, 3 }
 0x12e   :  { %v411_v33 = vpop.f32.mrb[4].mxu1  ;;  %v324_v36 = vpop.f32.mrb[4].mxu0 }
 0x12f   :  { %v1836_v35 = vpop.f32.mrb[5].mxu1  ;;  %v432_v37 = vadd.f32 %v2420_v17, %v411_v33  ;;  %v1828_v39 = vpop.f32.mrb[5].mxu0  ;;  %v345_v42 = vadd.f32 %v2430_v34, %v324_v36 }
 0x130   :  { %v414_v38 = vpop.f32.mrb[6].mxu1  ;;  %v327_v41 = vpop.f32.mrb[6].mxu0 }
 0x131   :  { %434 = vrot.lane.b32.xlu1 %v432_v37, %s2240_s1  ;;  %v1837_v40 = vpop.f32.mrb[7].mxu1  ;;  %v1829_v43 = vpop.f32.mrb[7].mxu0  ;;  %v273_v46 = vld [vmem:[#allocation2] sm:$0xf]  ;;  %v468_v38 = vld [vmem:[#allocation2 + $0x4] sm:$0xf] }
 0x132   :  { %v274_v44 = vld [vmem:[#allocation3 + $0x1c] sm:$0xf]  ;;  %v330_v48 = vadd.f32 %v324_v36, %v273_v46  ;;  %v469_v36 = vld [vmem:[#allocation3 + $0x18] sm:$0xf] }
 0x133   :  { %v417_v45 = vadd.f32 %v411_v33, %v274_v44 }
 0x134   :  { %v1716_v49 = vmul.f32 -1.442695, %v330_v48 }
 0x135   :  { %347 = vrot.lane.b32.xlu1 %v345_v42, %s2240_s1  ;;  %v1720_v47 = vmul.f32 -1.442695, %v417_v45 }
 0x137   :  { %1974 = vpow2.f32 %v1720_v47 }
 0x138   :  { %1976 = vpow2.f32 %v1716_v49 }
 0x141   :  { %v1975_v50 = vpop.eup %1974 }
 0x142   :  { %v421_v51 = vadd.f32 1.0, %v1975_v50  ;;  %v1977_v52 = vpop.eup %1976 }
 0x143   :  { %v334_v53 = vadd.f32 1.0, %v1977_v52 }
 0x144   :  { %1978 = vrcp.f32 %v421_v51 }
 0x145   :  { %1980 = vrcp.f32 %v334_v53 }
 0x14e   :  { %v1979_v54 = vpop.eup %1978 }
 0x14f   :  { %v1981_v57 = vpop.eup %1980  ;;  %v444_v2 = vsub.f32 1.0, %v1979_v54  ;;  %v450_v4 = vmul.f32 0.0, %v1979_v54 }
 0x150   :  { %v357_v12 = vsub.f32 1.0, %v1981_v57  ;;  %v363_v14 = vmul.f32 0.0, %v1981_v57 }
 0x1a3   :  { %v435_v55 = vpop.permute.xlu1 %434 }
 0x1a4   :  { %v437_v56 = vmul.f32 %v1979_v54, %v435_v55 }
 0x1a6   :  { %439 = vrot.lane.b32.xlu0 %v437_v56, %s2240_s1 }
 0x1a7   :  { %v348_v58 = vpop.permute.xlu1 %347 }
 0x1a8   :  { %v350_v59 = vmul.f32 %v1981_v57, %v348_v58 }
 0x1aa   :  { %352 = vrot.lane.b32.xlu1 %v350_v59, %s2240_s1 }
 0x218   :  { %v440_v60 = vpop.permute.xlu0 %439 }
 0x219   :  { %v442_v61 = vadd.f32 %v440_v60, %v274_v44 }
 0x21b   :  { %1982 = vtanh.f32 %v442_v61 }
 0x21c   :  { %v353_v62 = vpop.permute.xlu1 %352 }
 0x21d   :  { %v355_v63 = vadd.f32 %v353_v62, %v273_v46 }
 0x21f   :  { %1984 = vtanh.f32 %v355_v63 }
 0x225   :  { %v1983_v0 = vpop.eup %1982 }
 0x226   :  { %446 = vrot.lane.b32.xlu0 %v1983_v0, %s2247_s4 }
 0x229   :  { %v1985_v1 = vpop.eup %1984 }
 0x22a   :  { %359 = vrot.lane.b32.xlu1 %v1985_v1, %s2247_s4 }
 0x298   :  { %v447_v3 = vpop.permute.xlu0 %446 }
 0x299   :  { %v449_v5 = vmul.f32 %v447_v3, %v444_v2 }
 0x29b   :  { %v451_v10 = vadd.f32 %v450_v4, %v449_v5 }
 0x29c   :  { %v360_v13 = vpop.permute.xlu1 %359 }
 0x29d   :  { %v362_v15 = vmul.f32 %v360_v13, %v357_v12  ;;  %460 = vrot.lane.b32.xlu0 %v451_v10, %s2247_s4 }
 0x29f   :  { %v364_v16 = vadd.f32 %v363_v14, %v362_v15 }
 0x2a1   :  { %453 = vrot.lane.b32.xlu1 %v364_v16, %s2247_s4 }
 0x30f   :  { %v461_v19 = vpop.permute.xlu0 %460 }
 0x310   :  { %v2447_v20 = vsel %vm272_vm3, %v461_v19, 0.0 }
 0x311   :  { %465 = vst.msk [vmem:[#allocation13 + $0x1c] sm:$0xf] %vm457_vm4, %v2447_v20  ;;  %v545_v21 = vpack.c.bf16 %v2447_v20, %v2447_v20 }
 0x313   :  { %1851 = vmatmul.mubr.msk.bf16.vlgmr.msra.gmra.mrb[8].mxu1 %vm119_vm0, %v545_v21  ;;  %v454_v22 = vpop.permute.xlu1 %453 }
 0x314   :  { %v2457_v23 = vsel %vm271_vm5, %v454_v22, 0.0  ;;  %1863 = vmatpush3.bf16.msra.mxu1 %v2370_v6  ;;  %1866 = vmatprep.mubr.msk.bf16.mxu1 %vm2245_vm1, %v2244_v7 }
 0x315   :  { %458 = vst.msk [vmem:[#allocation12] sm:$0xf] %vm457_vm4, %v2457_v23  ;;  %v470_v24 = vpack.c.bf16 %v2457_v23, %v2457_v23  ;;  %1864 = vmatprep.subr.bf16.mxu1 %v2244_v7 }
 0x317   :  { %1843 = vmatmul.mubr.msk.bf16.vlgmr.msra.gmra.mrb[8].mxu0 %vm119_vm0, %v470_v24 }
 0x318   :  { %1855 = vmatpush3.bf16.msra.mxu0 %v2373_v8  ;;  %1865 = vmatpush3.bf16.msra.mxu1 %v2379_v9 }
 0x319   :  { %1856 = vmatprep.subr.bf16.mxu0 %v2244_v7  ;;  %1858 = vmatprep.mubr.msk.bf16.mxu0 %vm2245_vm1, %v2244_v7 }
 0x31a   :  { %1878 = vmatprep.subr.bf16.mxu1 %v2244_v7 }
 0x31c   :  { %1857 = vmatpush3.bf16.msra.mxu0 %v2386_v11 }
 0x31d   :  { %1870 = vmatprep.subr.bf16.mxu0 %v2244_v7 }
 0x3e6   :  { %v583_v25 = vpop.f32.mrb[8].mxu1 }
 0x3e7   :  { %v1852_v26 = vpop.f32.mrb[9].mxu1  ;;  %v596_v27 = vadd.f32 %v583_v25, %v2420_v17  ;;  %v589_v37 = vadd.f32 %v583_v25, %v469_v36 }
 0x3e8   :  { %v586_v28 = vpop.f32.mrb[10].mxu1 }
 0x3e9   :  { %598 = vrot.lane.b32.xlu0 %v596_v27, %s2240_s1  ;;  %v1853_v29 = vpop.f32.mrb[11].mxu1  ;;  %v1725_v39 = vmul.f32 -1.442695, %v589_v37 }
 0x3ea   :  { %v508_v30 = vpop.f32.mrb[8].mxu0 }
 0x3eb   :  { %v1844_v31 = vpop.f32.mrb[9].mxu0  ;;  %v521_v32 = vadd.f32 %v508_v30, %v2430_v34  ;;  %v514_v40 = vadd.f32 %v508_v30, %v468_v38  ;;  %1986 = vpow2.f32 %v1725_v39 }
 0x3ec   :  { %v511_v33 = vpop.f32.mrb[10].mxu0  ;;  %v639_v31 = vld [vmem:[#allocation3 + $0x14] sm:$0xf] }
 0x3ed   :  { %523 = vrot.lane.b32.xlu1 %v521_v32, %s2240_s1  ;;  %v1845_v35 = vpop.f32.mrb[11].mxu0  ;;  %v1723_v41 = vmul.f32 -1.442695, %v514_v40  ;;  %v638_v33 = vld [vmem:[#allocation2 + $0x8] sm:$0xf] }
 0x3ef   :  { %1988 = vpow2.f32 %v1723_v41 }
 0x3f5   :  { %v1987_v42 = vpop.eup %1986 }
 0x3f6   :  { %v593_v43 = vadd.f32 1.0, %v1987_v42 }
 0x3f8   :  { %1990 = vrcp.f32 %v593_v43 }
 0x3f9   :  { %v1989_v44 = vpop.eup %1988 }
 0x3fa   :  { %v518_v45 = vadd.f32 1.0, %v1989_v44 }
 0x3fc   :  { %1992 = vrcp.f32 %v518_v45 }
 0x402   :  { %v1991_v46 = vpop.eup %1990 }
 0x403   :  { %v608_v59 = vsub.f32 1.0, %v1991_v46 }
 0x406   :  { %v1993_v49 = vpop.eup %1992 }
 0x407   :  { %v533_v1 = vsub.f32 1.0, %v1993_v49 }
 0x45b   :  { %v599_v47 = vpop.permute.xlu0 %598 }
 0x45c   :  { %v601_v48 = vmul.f32 %v1991_v46, %v599_v47 }
 0x45e   :  { %603 = vrot.lane.b32.xlu0 %v601_v48, %s2240_s1 }
 0x45f   :  { %v524_v50 = vpop.permute.xlu1 %523 }
 0x460   :  { %v526_v51 = vmul.f32 %v1993_v49, %v524_v50 }
 0x462   :  { %528 = vrot.lane.b32.xlu1 %v526_v51, %s2240_s1 }
 0x466   :  { %615 = vrot.lane.b32.xlu1 %v2447_v20, %s2248_s16 }
 0x46a   :  { %540 = vrot.lane.b32.xlu1 %v2457_v23, %s2248_s16 }
 0x4d0   :  { %v604_v52 = vpop.permute.xlu0 %603 }
 0x4d1   :  { %v606_v53 = vadd.f32 %v604_v52, %v469_v36 }
 0x4d3   :  { %1994 = vtanh.f32 %v606_v53 }
 0x4d4   :  { %v529_v54 = vpop.permute.xlu1 %528 }
 0x4d5   :  { %v531_v55 = vadd.f32 %v529_v54, %v468_v38 }
 0x4d7   :  { %1996 = vtanh.f32 %v531_v55 }
 0x4d8   :  { %v616_v58 = vpop.permute.xlu1 %615 }
 0x4d9   :  { %v618_v61 = vmul.f32 %v1991_v46, %v616_v58 }
 0x4dc   :  { %v541_v63 = vpop.permute.xlu1 %540 }
 0x4dd   :  { %v1995_v56 = vpop.eup %1994  ;;  %v543_v3 = vmul.f32 %v1993_v49, %v541_v63 }
 0x4de   :  { %610 = vrot.lane.b32.xlu0 %v1995_v56, %s2247_s4 }
 0x4e1   :  { %v1997_v57 = vpop.eup %1996 }
 0x4e2   :  { %535 = vrot.lane.b32.xlu0 %v1997_v57, %s2247_s4 }
 0x550   :  { %v611_v60 = vpop.permute.xlu0 %610 }
 0x551   :  { %v613_v62 = vmul.f32 %v611_v60, %v608_v59 }
 0x553   :  { %v619_v0 = vadd.f32 %v618_v61, %v613_v62 }
 0x554   :  { %v536_v2 = vpop.permute.xlu0 %535 }
 0x555   :  { %v538_v4 = vmul.f32 %v536_v2, %v533_v1  ;;  %628 = vrot.lane.b32.xlu0 %v619_v0, %s2247_s4 }
 0x557   :  { %v544_v5 = vadd.f32 %v543_v3, %v538_v4 }
 0x559   :  { %621 = vrot.lane.b32.xlu1 %v544_v5, %s2247_s4 }
 0x5c7   :  { %v629_v10 = vpop.permute.xlu0 %628 }
 0x5c8   :  { %v631_v12 = vsel %vm467_vm6, %v629_v10, 0.0  ;;  %v2496_v13 = vsel %vm467_vm6, %v629_v10, %v2447_v20 }
 0x5c9   :  { %633 = vst.msk [vmem:[#allocation13 + $0x18] sm:$0xf] %vm457_vm4, %v631_v12  ;;  %v715_v14 = vpack.c.bf16 %v2496_v13, %v2496_v13 }
 0x5cb   :  { %1867 = vmatmul.mubr.msk.bf16.vlgmr.msra.gmra.mrb[12].mxu1 %vm119_vm0, %v715_v14  ;;  %v622_v15 = vpop.permute.xlu1 %621 }
 0x5cc   :  { %v624_v16 = vsel %vm466_vm7, %v622_v15, 0.0  ;;  %v2508_v19 = vsel %vm466_vm7, %v622_v15, %v2457_v23  ;;  %1879 = vmatpush3.bf16.msra.mxu1 %v2370_v6  ;;  %1882 = vmatprep.mubr.msk.bf16.mxu1 %vm2245_vm1, %v2244_v7 }
 0x5cd   :  { %626 = vst.msk [vmem:[#allocation12 + $0x4] sm:$0xf] %vm457_vm4, %v624_v16  ;;  %v640_v20 = vpack.c.bf16 %v2508_v19, %v2508_v19  ;;  %1880 = vmatprep.subr.bf16.mxu1 %v2244_v7 }
 0x5cf   :  { %1859 = vmatmul.mubr.msk.bf16.vlgmr.msra.gmra.mrb[12].mxu0 %vm119_vm0, %v640_v20 }
 0x5d0   :  { %1871 = vmatpush3.bf16.msra.mxu0 %v2373_v8  ;;  %1881 = vmatpush3.bf16.msra.mxu1 %v2379_v9 }
 0x5d1   :  { %1872 = vmatprep.subr.bf16.mxu0 %v2244_v7  ;;  %1874 = vmatprep.mubr.msk.bf16.mxu0 %vm2245_vm1, %v2244_v7 }
 0x5d2   :  { %1894 = vmatprep.subr.bf16.mxu1 %v2244_v7 }
 0x5d4   :  { %1873 = vmatpush3.bf16.msra.mxu0 %v2386_v11 }
 0x5d5   :  { %1886 = vmatprep.subr.bf16.mxu0 %v2244_v7 }
 0x69e   :  { %v753_v21 = vpop.f32.mrb[12].mxu1 }
 0x69f   :  { %v1868_v22 = vpop.f32.mrb[13].mxu1  ;;  %v766_v23 = vadd.f32 %v753_v21, %v2420_v17  ;;  %v759_v32 = vadd.f32 %v753_v21, %v639_v31 }
 0x6a0   :  { %v756_v24 = vpop.f32.mrb[14].mxu1 }
 0x6a1   :  { %768 = vrot.lane.b32.xlu0 %v766_v23, %s2240_s1  ;;  %v1869_v25 = vpop.f32.mrb[15].mxu1  ;;  %v1729_v35 = vmul.f32 -1.442695, %v759_v32 }
 0x6a2   :  { %v678_v26 = vpop.f32.mrb[12].mxu0 }
 0x6a3   :  { %v1860_v27 = vpop.f32.mrb[13].mxu0  ;;  %v691_v28 = vadd.f32 %v678_v26, %v2430_v34  ;;  %v684_v36 = vadd.f32 %v678_v26, %v638_v33  ;;  %1998 = vpow2.f32 %v1729_v35 }
 0x6a4   :  { %v681_v29 = vpop.f32.mrb[14].mxu0  ;;  %v809_v27 = vld [vmem:[#allocation3 + $0x10] sm:$0xf] }
 0x6a5   :  { %693 = vrot.lane.b32.xlu1 %v691_v28, %s2240_s1  ;;  %v1861_v30 = vpop.f32.mrb[15].mxu0  ;;  %v1727_v37 = vmul.f32 -1.442695, %v684_v36  ;;  %v808_v29 = vld [vmem:[#allocation2 + $0xc] sm:$0xf] }
 0x6a7   :  { %2000 = vpow2.f32 %v1727_v37 }
 0x6ad   :  { %v1999_v38 = vpop.eup %1998 }
 0x6ae   :  { %v763_v39 = vadd.f32 1.0, %v1999_v38 }
 0x6b0   :  { %2002 = vrcp.f32 %v763_v39 }
 0x6b1   :  { %v2001_v40 = vpop.eup %2000 }
 0x6b2   :  { %v688_v41 = vadd.f32 1.0, %v2001_v40 }
 0x6b4   :  { %2004 = vrcp.f32 %v688_v41 }
 0x6ba   :  { %v2003_v42 = vpop.eup %2002 }
 0x6bb   :  { %v778_v55 = vsub.f32 1.0, %v2003_v42 }
 0x6be   :  { %v2005_v45 = vpop.eup %2004 }
 0x6bf   :  { %v703_v61 = vsub.f32 1.0, %v2005_v45 }
 0x713   :  { %v769_v43 = vpop.permute.xlu0 %768 }
 0x714   :  { %v771_v44 = vmul.f32 %v2003_v42, %v769_v43 }
 0x716   :  { %773 = vrot.lane.b32.xlu0 %v771_v44, %s2240_s1 }
 0x717   :  { %v694_v46 = vpop.permute.xlu1 %693 }
 0x718   :  { %v696_v47 = vmul.f32 %v2005_v45, %v694_v46 }
 0x71a   :  { %698 = vrot.lane.b32.xlu1 %v696_v47, %s2240_s1 }
 0x71e   :  { %785 = vrot.lane.b32.xlu1 %v2496_v13, %s2248_s16 }
 0x722   :  { %710 = vrot.lane.b32.xlu1 %v2508_v19, %s2248_s16 }
 0x788   :  { %v774_v48 = vpop.permute.xlu0 %773 }
 0x789   :  { %v776_v49 = vadd.f32 %v774_v48, %v639_v31 }
 0x78b   :  { %2006 = vtanh.f32 %v776_v49 }
 0x78c   :  { %v699_v50 = vpop.permute.xlu1 %698 }
 0x78d   :  { %v701_v51 = vadd.f32 %v699_v50, %v638_v33 }
 0x78f   :  { %2008 = vtanh.f32 %v701_v51 }
 0x790   :  { %v786_v54 = vpop.permute.xlu1 %785 }
 0x791   :  { %v788_v57 = vmul.f32 %v2003_v42, %v786_v54 }
 0x794   :  { %v711_v59 = vpop.permute.xlu1 %710 }
 0x795   :  { %v2007_v52 = vpop.eup %2006  ;;  %v713_v63 = vmul.f32 %v2005_v45, %v711_v59 }
 0x796   :  { %780 = vrot.lane.b32.xlu0 %v2007_v52, %s2247_s4 }
 0x799   :  { %v2009_v53 = vpop.eup %2008 }
 0x79a   :  { %705 = vrot.lane.b32.xlu0 %v2009_v53, %s2247_s4 }
 0x808   :  { %v781_v56 = vpop.permute.xlu0 %780 }
 0x809   :  { %v783_v58 = vmul.f32 %v781_v56, %v778_v55 }
 0x80b   :  { %v789_v60 = vadd.f32 %v788_v57, %v783_v58 }
 0x80c   :  { %v706_v62 = vpop.permute.xlu0 %705 }
 0x80d   :  { %v708_v0 = vmul.f32 %v706_v62, %v703_v61  ;;  %798 = vrot.lane.b32.xlu0 %v789_v60, %s2247_s4 }
 0x80f   :  { %v714_v1 = vadd.f32 %v713_v63, %v708_v0 }
 0x811   :  { %791 = vrot.lane.b32.xlu1 %v714_v1, %s2247_s4 }
 0x87f   :  { %v799_v2 = vpop.permute.xlu0 %798 }
 0x880   :  { %v801_v3 = vsel %vm637_vm8, %v799_v2, 0.0  ;;  %v2546_v4 = vsel %vm637_vm8, %v799_v2, %v2496_v13 }
 0x881   :  { %803 = vst.msk [vmem:[#allocation13 + $0x14] sm:$0xf] %vm457_vm4, %v801_v3  ;;  %v885_v5 = vpack.c.bf16 %v2546_v4, %v2546_v4 }
 0x883   :  { %1883 = vmatmul.mubr.msk.bf16.vlgmr.msra.gmra.mrb[16].mxu1 %vm119_vm0, %v885_v5  ;;  %v792_v10 = vpop.permute.xlu1 %791 }
 0x884   :  { %v794_v12 = vsel %vm636_vm9, %v792_v10, 0.0  ;;  %v2558_v14 = vsel %vm636_vm9, %v792_v10, %v2508_v19  ;;  %1895 = vmatpush3.bf16.msra.mxu1 %v2370_v6  ;;  %1898 = vmatprep.mubr.msk.bf16.mxu1 %vm2245_vm1, %v2244_v7 }
 0x885   :  { %796 = vst.msk [vmem:[#allocation12 + $0x8] sm:$0xf] %vm457_vm4, %v794_v12  ;;  %v810_v13 = vpack.c.bf16 %v2558_v14, %v2558_v14  ;;  %1896 = vmatprep.subr.bf16.mxu1 %v2244_v7 }
 0x887   :  { %1875 = vmatmul.mubr.msk.bf16.vlgmr.msra.gmra.mrb[16].mxu0 %vm119_vm0, %v810_v13 }
 0x888   :  { %1887 = vmatpush3.bf16.msra.mxu0 %v2373_v8  ;;  %1897 = vmatpush3.bf16.msra.mxu1 %v2379_v9 }
 0x889   :  { %1888 = vmatprep.subr.bf16.mxu0 %v2244_v7  ;;  %1890 = vmatprep.mubr.msk.bf16.mxu0 %vm2245_vm1, %v2244_v7 }
 0x88a   :  { %1910 = vmatprep.subr.bf16.mxu1 %v2244_v7 }
 0x88c   :  { %1889 = vmatpush3.bf16.msra.mxu0 %v2386_v11 }
 0x88d   :  { %1902 = vmatprep.subr.bf16.mxu0 %v2244_v7 }
 0x956   :  { %v923_v15 = vpop.f32.mrb[16].mxu1 }
 0x957   :  { %v1884_v16 = vpop.f32.mrb[17].mxu1  ;;  %v936_v19 = vadd.f32 %v923_v15, %v2420_v17  ;;  %v929_v28 = vadd.f32 %v923_v15, %v809_v27 }
 0x958   :  { %v926_v20 = vpop.f32.mrb[18].mxu1 }
 0x959   :  { %938 = vrot.lane.b32.xlu0 %v936_v19, %s2240_s1  ;;  %v1885_v21 = vpop.f32.mrb[19].mxu1  ;;  %v1733_v30 = vmul.f32 -1.442695, %v929_v28 }
 0x95a   :  { %v848_v22 = vpop.f32.mrb[16].mxu0 }
 0x95b   :  { %v1876_v23 = vpop.f32.mrb[17].mxu0  ;;  %v861_v24 = vadd.f32 %v848_v22, %v2430_v34  ;;  %v854_v31 = vadd.f32 %v848_v22, %v808_v29  ;;  %2010 = vpow2.f32 %v1733_v30 }
 0x95c   :  { %v851_v25 = vpop.f32.mrb[18].mxu0  ;;  %v977_v23 = vld [vmem:[#allocation3 + $0xc] sm:$0xf] }
 0x95d   :  { %863 = vrot.lane.b32.xlu1 %v861_v24, %s2240_s1  ;;  %v1877_v26 = vpop.f32.mrb[19].mxu0  ;;  %v1731_v32 = vmul.f32 -1.442695, %v854_v31  ;;  %v976_v25 = vld [vmem:[#allocation2 + $0x10] sm:$0xf] }
 0x95f   :  { %2012 = vpow2.f32 %v1731_v32 }
 0x965   :  { %v2011_v33 = vpop.eup %2010 }
 0x966   :  { %v933_v35 = vadd.f32 1.0, %v2011_v33 }
 0x968   :  { %2014 = vrcp.f32 %v933_v35 }
 0x969   :  { %v2013_v36 = vpop.eup %2012 }
 0x96a   :  { %v858_v37 = vadd.f32 1.0, %v2013_v36 }
 0x96c   :  { %2016 = vrcp.f32 %v858_v37 }
 0x972   :  { %v2015_v38 = vpop.eup %2014 }
 0x973   :  { %v948_v51 = vsub.f32 1.0, %v2015_v38 }
 0x976   :  { %v2017_v41 = vpop.eup %2016 }
 0x977   :  { %v873_v57 = vsub.f32 1.0, %v2017_v41 }
 0x9cb   :  { %v939_v39 = vpop.permute.xlu0 %938 }
 0x9cc   :  { %v941_v40 = vmul.f32 %v2015_v38, %v939_v39 }
 0x9ce   :  { %943 = vrot.lane.b32.xlu0 %v941_v40, %s2240_s1 }
 0x9cf   :  { %v864_v42 = vpop.permute.xlu1 %863 }
 0x9d0   :  { %v866_v43 = vmul.f32 %v2017_v41, %v864_v42 }
 0x9d2   :  { %868 = vrot.lane.b32.xlu1 %v866_v43, %s2240_s1 }
 0x9d6   :  { %955 = vrot.lane.b32.xlu1 %v2546_v4, %s2248_s16 }
 0x9da   :  { %880 = vrot.lane.b32.xlu1 %v2558_v14, %s2248_s16 }
 0xa40   :  { %v944_v44 = vpop.permute.xlu0 %943 }
 0xa41   :  { %v946_v45 = vadd.f32 %v944_v44, %v809_v27 }
 0xa43   :  { %2018 = vtanh.f32 %v946_v45 }
 0xa44   :  { %v869_v46 = vpop.permute.xlu1 %868 }
 0xa45   :  { %v871_v47 = vadd.f32 %v869_v46, %v808_v29 }
 0xa47   :  { %2020 = vtanh.f32 %v871_v47 }
 0xa48   :  { %v956_v50 = vpop.permute.xlu1 %955 }
 0xa49   :  { %v958_v53 = vmul.f32 %v2015_v38, %v956_v50 }
 0xa4c   :  { %v881_v55 = vpop.permute.xlu1 %880 }
 0xa4d   :  { %v2019_v48 = vpop.eup %2018  ;;  %v883_v59 = vmul.f32 %v2017_v41, %v881_v55 }
 0xa4e   :  { %950 = vrot.lane.b32.xlu0 %v2019_v48, %s2247_s4 }
 0xa51   :  { %v2021_v49 = vpop.eup %2020 }
 0xa52   :  { %875 = vrot.lane.b32.xlu0 %v2021_v49, %s2247_s4 }
 0xac0   :  { %v951_v52 = vpop.permute.xlu0 %950 }
 0xac1   :  { %v953_v54 = vmul.f32 %v951_v52, %v948_v51 }
 0xac3   :  { %v959_v56 = vadd.f32 %v958_v53, %v953_v54 }
 0xac4   :  { %v876_v58 = vpop.permute.xlu0 %875 }
 0xac5   :  { %v878_v60 = vmul.f32 %v876_v58, %v873_v57  ;;  %968 = vrot.lane.b32.xlu0 %v959_v56, %s2247_s4 }
 0xac7   :  { %v884_v61 = vadd.f32 %v883_v59, %v878_v60 }
 0xac9   :  { %961 = vrot.lane.b32.xlu1 %v884_v61, %s2247_s4 }
 0xb37   :  { %v969_v62 = vpop.permute.xlu0 %968 }
 0xb38   :  { %v971_v63 = vsel %vm807_vm10, %v969_v62, 0.0  ;;  %v2596_v0 = vsel %vm807_vm10, %v969_v62, %v2546_v4 }
 0xb39   :  { %973 = vst.msk [vmem:[#allocation13 + $0x10] sm:$0xf] %vm457_vm4, %v971_v63  ;;  %v1053_v1 = vpack.c.bf16 %v2596_v0, %v2596_v0 }
 0xb3b   :  { %1899 = vmatmul.mubr.msk.bf16.vlgmr.msra.gmra.mrb[20].mxu1 %vm119_vm0, %v1053_v1  ;;  %v962_v2 = vpop.permute.xlu1 %961 }
 0xb3c   :  { %v964_v3 = vsel %vm806_vm11, %v962_v2, 0.0  ;;  %v2608_v5 = vsel %vm806_vm11, %v962_v2, %v2558_v14  ;;  %1911 = vmatpush3.bf16.msra.mxu1 %v2370_v6  ;;  %1914 = vmatprep.mubr.msk.bf16.mxu1 %vm2245_vm1, %v2244_v7 }
 0xb3d   :  { %966 = vst.msk [vmem:[#allocation12 + $0xc] sm:$0xf] %vm457_vm4, %v964_v3  ;;  %v978_v4 = vpack.c.bf16 %v2608_v5, %v2608_v5  ;;  %1912 = vmatprep.subr.bf16.mxu1 %v2244_v7 }
 0xb3f   :  { %1891 = vmatmul.mubr.msk.bf16.vlgmr.msra.gmra.mrb[20].mxu0 %vm119_vm0, %v978_v4 }
 0xb40   :  { %1903 = vmatpush3.bf16.msra.mxu0 %v2373_v8  ;;  %1913 = vmatpush3.bf16.msra.mxu1 %v2379_v9 }
 0xb41   :  { %1904 = vmatprep.subr.bf16.mxu0 %v2244_v7  ;;  %1906 = vmatprep.mubr.msk.bf16.mxu0 %vm2245_vm1, %v2244_v7 }
 0xb42   :  { %1926 = vmatprep.subr.bf16.mxu1 %v2244_v7 }
 0xb44   :  { %1905 = vmatpush3.bf16.msra.mxu0 %v2386_v11 }
 0xb45   :  { %1918 = vmatprep.subr.bf16.mxu0 %v2244_v7 }
 0xc0e   :  { %v1091_v10 = vpop.f32.mrb[20].mxu1 }
 0xc0f   :  { %v1900_v12 = vpop.f32.mrb[21].mxu1  ;;  %v1104_v14 = vadd.f32 %v1091_v10, %v2420_v17  ;;  %v1097_v24 = vadd.f32 %v1091_v10, %v977_v23 }
 0xc10   :  { %v1094_v13 = vpop.f32.mrb[22].mxu1 }
 0xc11   :  { %1106 = vrot.lane.b32.xlu0 %v1104_v14, %s2240_s1  ;;  %v1901_v15 = vpop.f32.mrb[23].mxu1  ;;  %v1737_v26 = vmul.f32 -1.442695, %v1097_v24  ;;  %v1145_v13 = vld [vmem:[#allocation3 + $0x8] sm:$0xf] }
 0xc12   :  { %v1016_v16 = vpop.f32.mrb[20].mxu0  ;;  %v1144_v15 = vld [vmem:[#allocation2 + $0x14] sm:$0xf] }
 0xc13   :  { %v1892_v19 = vpop.f32.mrb[21].mxu0  ;;  %v1029_v20 = vadd.f32 %v1016_v16, %v2430_v34  ;;  %v1022_v27 = vadd.f32 %v1016_v16, %v976_v25  ;;  %2022 = vpow2.f32 %v1737_v26 }
 0xc14   :  { %v1019_v21 = vpop.f32.mrb[22].mxu0 }
 0xc15   :  { %1031 = vrot.lane.b32.xlu1 %v1029_v20, %s2240_s1  ;;  %v1893_v22 = vpop.f32.mrb[23].mxu0  ;;  %v1735_v28 = vmul.f32 -1.442695, %v1022_v27 }
 0xc17   :  { %2024 = vpow2.f32 %v1735_v28 }
 0xc1d   :  { %v2023_v29 = vpop.eup %2022 }
 0xc1e   :  { %v1101_v30 = vadd.f32 1.0, %v2023_v29 }
 0xc20   :  { %2026 = vrcp.f32 %v1101_v30 }
 0xc21   :  { %v2025_v31 = vpop.eup %2024 }
 0xc22   :  { %v1026_v32 = vadd.f32 1.0, %v2025_v31 }
 0xc24   :  { %2028 = vrcp.f32 %v1026_v32 }
 0xc2a   :  { %v2027_v33 = vpop.eup %2026 }
 0xc2b   :  { %v1116_v47 = vsub.f32 1.0, %v2027_v33 }
 0xc2e   :  { %v2029_v37 = vpop.eup %2028 }
 0xc2f   :  { %v1041_v53 = vsub.f32 1.0, %v2029_v37 }
 0xc83   :  { %v1107_v35 = vpop.permute.xlu0 %1106 }
 0xc84   :  { %v1109_v36 = vmul.f32 %v2027_v33, %v1107_v35 }
 0xc86   :  { %1111 = vrot.lane.b32.xlu0 %v1109_v36, %s2240_s1 }
 0xc87   :  { %v1032_v38 = vpop.permute.xlu1 %1031 }
 0xc88   :  { %v1034_v39 = vmul.f32 %v2029_v37, %v1032_v38 }
 0xc8a   :  { %1036 = vrot.lane.b32.xlu1 %v1034_v39, %s2240_s1 }
 0xc8e   :  { %1123 = vrot.lane.b32.xlu1 %v2596_v0, %s2248_s16 }
 0xc92   :  { %1048 = vrot.lane.b32.xlu1 %v2608_v5, %s2248_s16 }
 0xcf8   :  { %v1112_v40 = vpop.permute.xlu0 %1111 }
 0xcf9   :  { %v1114_v41 = vadd.f32 %v1112_v40, %v977_v23 }
 0xcfb   :  { %2030 = vtanh.f32 %v1114_v41 }
 0xcfc   :  { %v1037_v42 = vpop.permute.xlu1 %1036 }
 0xcfd   :  { %v1039_v43 = vadd.f32 %v1037_v42, %v976_v25 }
 0xcff   :  { %2032 = vtanh.f32 %v1039_v43 }
 0xd00   :  { %v1124_v46 = vpop.permute.xlu1 %1123 }
 0xd01   :  { %v1126_v49 = vmul.f32 %v2027_v33, %v1124_v46 }
 0xd04   :  { %v1049_v51 = vpop.permute.xlu1 %1048 }
 0xd05   :  { %v2031_v44 = vpop.eup %2030  ;;  %v1051_v55 = vmul.f32 %v2029_v37, %v1049_v51 }
 0xd06   :  { %1118 = vrot.lane.b32.xlu0 %v2031_v44, %s2247_s4 }
 0xd09   :  { %v2033_v45 = vpop.eup %2032 }
 0xd0a   :  { %1043 = vrot.lane.b32.xlu0 %v2033_v45, %s2247_s4 }
 0xd78   :  { %v1119_v48 = vpop.permute.xlu0 %1118 }
 0xd79   :  { %v1121_v50 = vmul.f32 %v1119_v48, %v1116_v47 }
 0xd7b   :  { %v1127_v52 = vadd.f32 %v1126_v49, %v1121_v50 }
 0xd7c   :  { %v1044_v54 = vpop.permute.xlu0 %1043 }
 0xd7d   :  { %v1046_v56 = vmul.f32 %v1044_v54, %v1041_v53  ;;  %1136 = vrot.lane.b32.xlu0 %v1127_v52, %s2247_s4 }
 0xd7f   :  { %v1052_v57 = vadd.f32 %v1051_v55, %v1046_v56 }
 0xd81   :  { %1129 = vrot.lane.b32.xlu1 %v1052_v57, %s2247_s4  ;;  %v2070_v57 = vld [vmem:[#allocation10 + $0x10] sm:$0xff]  }
 0xdef   :  { %v1137_v58 = vpop.permute.xlu0 %1136 }
 0xdf0   :  { %v1139_v59 = vsel %vm806_vm11, %v1137_v58, 0.0  ;;  %v2645_v60 = vsel %vm806_vm11, %v1137_v58, %v2596_v0 }
 0xdf1   :  { %1141 = vst.msk [vmem:[#allocation13 + $0xc] sm:$0xf] %vm457_vm4, %v1139_v59  ;;  %v1221_v61 = vpack.c.bf16 %v2645_v60, %v2645_v60  ;;  %v2071_v59 = vld [vmem:[#allocation10] sm:$0xff]  }
 0xdf3   :  { %1915 = vmatmul.mubr.msk.bf16.vlgmr.msra.gmra.mrb[24].mxu1 %vm119_vm0, %v1221_v61  ;;  %v1130_v62 = vpop.permute.xlu1 %1129  ;;  %v2073_v61 = vld [vmem:[#allocation10 + $0x8] sm:$0xff]  }
 0xdf4   :  { %v1132_v63 = vsel %vm807_vm10, %v1130_v62, 0.0  ;;  %v2656_v1 = vsel %vm807_vm10, %v1130_v62, %v2608_v5  ;;  %1927 = vmatpush3.bf16.msra.mxu1 %v2370_v6  ;;  %1930 = vmatprep.mubr.msk.bf16.mxu1 %vm2245_vm1, %v2244_v7 }
 0xdf5   :  { %1134 = vst.msk [vmem:[#allocation12 + $0x10] sm:$0xf] %vm457_vm4, %v1132_v63  ;;  %v1146_v0 = vpack.c.bf16 %v2656_v1, %v2656_v1  ;;  %1928 = vmatprep.subr.bf16.mxu1 %v2244_v7 }
 0xdf7   :  { %1907 = vmatmul.mubr.msk.bf16.vlgmr.msra.gmra.mrb[24].mxu0 %vm119_vm0, %v1146_v0 }
 0xdf8   :  { %1919 = vmatpush3.bf16.msra.mxu0 %v2373_v8  ;;  %1929 = vmatpush3.bf16.msra.mxu1 %v2379_v9 }
 0xdf9   :  { %1920 = vmatprep.subr.bf16.mxu0 %v2244_v7  ;;  %1922 = vmatprep.mubr.msk.bf16.mxu0 %vm2245_vm1, %v2244_v7 }
 0xdfa   :  { %1942 = vmatprep.subr.bf16.mxu1 %v2244_v7 }
 0xdfc   :  { %1921 = vmatpush3.bf16.msra.mxu0 %v2386_v11 }
 0xdfd   :  { %1934 = vmatprep.subr.bf16.mxu0 %v2244_v7 }
 0xec6   :  { %v1259_v6 = vpop.f32.mrb[24].mxu1 }
 0xec7   :  { %v1916_v2 = vpop.f32.mrb[25].mxu1  ;;  %v1272_v3 = vadd.f32 %v1259_v6, %v2420_v17  ;;  %v1265_v11 = vadd.f32 %v1259_v6, %v1145_v13 }
 0xec8   :  { %v1262_v5 = vpop.f32.mrb[26].mxu1 }
 0xec9   :  { %1274 = vrot.lane.b32.xlu0 %v1272_v3, %s2240_s1  ;;  %v1917_v8 = vpop.f32.mrb[27].mxu1  ;;  %v1741_v16 = vmul.f32 -1.442695, %v1265_v11 }
 0xeca   :  { %v1184_v9 = vpop.f32.mrb[24].mxu0 }
 0xecb   :  { %v1908_v4 = vpop.f32.mrb[25].mxu0  ;;  %v1197_v10 = vadd.f32 %v1184_v9, %v2430_v34  ;;  %v1190_v19 = vadd.f32 %v1184_v9, %v1144_v15  ;;  %2034 = vpow2.f32 %v1741_v16 }
 0xecc   :  { %v1187_v12 = vpop.f32.mrb[26].mxu0  ;;  %v1313_v4 = vld [vmem:[#allocation3 + $0x4] sm:$0xf] }
 0xecd   :  { %1199 = vrot.lane.b32.xlu1 %v1197_v10, %s2240_s1  ;;  %v1909_v14 = vpop.f32.mrb[27].mxu0  ;;  %v1739_v20 = vmul.f32 -1.442695, %v1190_v19  ;;  %v1312_v10 = vld [vmem:[#allocation2 + $0x18] sm:$0xf] }
 0xecf   :  { %2036 = vpow2.f32 %v1739_v20 }
 0xed5   :  { %v2035_v21 = vpop.eup %2034 }
 0xed6   :  { %v1269_v22 = vadd.f32 1.0, %v2035_v21 }
 0xed8   :  { %2038 = vrcp.f32 %v1269_v22 }
 0xed9   :  { %v2037_v23 = vpop.eup %2036 }
 0xeda   :  { %v1194_v24 = vadd.f32 1.0, %v2037_v23 }
 0xedc   :  { %2040 = vrcp.f32 %v1194_v24 }
 0xee2   :  { %v2039_v25 = vpop.eup %2038 }
 0xee3   :  { %v1284_v39 = vsub.f32 1.0, %v2039_v25 }
 0xee6   :  { %v2041_v28 = vpop.eup %2040 }
 0xee7   :  { %v1209_v45 = vsub.f32 1.0, %v2041_v28 }
 0xf3b   :  { %v1275_v26 = vpop.permute.xlu0 %1274 }
 0xf3c   :  { %v1277_v27 = vmul.f32 %v2039_v25, %v1275_v26 }
 0xf3e   :  { %1279 = vrot.lane.b32.xlu0 %v1277_v27, %s2240_s1 }
 0xf3f   :  { %v1200_v29 = vpop.permute.xlu1 %1199 }
 0xf40   :  { %v1202_v30 = vmul.f32 %v2041_v28, %v1200_v29 }
 0xf42   :  { %1204 = vrot.lane.b32.xlu1 %v1202_v30, %s2240_s1 }
 0xf46   :  { %1291 = vrot.lane.b32.xlu1 %v2645_v60, %s2248_s16 }
 0xf4a   :  { %1216 = vrot.lane.b32.xlu1 %v2656_v1, %s2248_s16 }
 0xfb0   :  { %v1280_v31 = vpop.permute.xlu0 %1279 }
 0xfb1   :  { %v1282_v32 = vadd.f32 %v1280_v31, %v1145_v13 }
 0xfb3   :  { %2042 = vtanh.f32 %v1282_v32 }
 0xfb4   :  { %v1205_v33 = vpop.permute.xlu1 %1204 }
 0xfb5   :  { %v1207_v35 = vadd.f32 %v1205_v33, %v1144_v15 }
 0xfb7   :  { %2044 = vtanh.f32 %v1207_v35 }
 0xfb8   :  { %v1292_v38 = vpop.permute.xlu1 %1291 }
 0xfb9   :  { %v1294_v41 = vmul.f32 %v2039_v25, %v1292_v38 }
 0xfbc   :  { %v1217_v43 = vpop.permute.xlu1 %1216 }
 0xfbd   :  { %v2043_v36 = vpop.eup %2042  ;;  %v1219_v47 = vmul.f32 %v2041_v28, %v1217_v43 }
 0xfbe   :  { %1286 = vrot.lane.b32.xlu0 %v2043_v36, %s2247_s4 }
 0xfc1   :  { %v2045_v37 = vpop.eup %2044 }
 0xfc2   :  { %1211 = vrot.lane.b32.xlu0 %v2045_v37, %s2247_s4 }
0x1030   :  { %v1287_v40 = vpop.permute.xlu0 %1286 }
0x1031   :  { %v1289_v42 = vmul.f32 %v1287_v40, %v1284_v39 }
0x1033   :  { %v1295_v44 = vadd.f32 %v1294_v41, %v1289_v42 }
0x1034   :  { %v1212_v46 = vpop.permute.xlu0 %1211 }
0x1035   :  { %v1214_v48 = vmul.f32 %v1212_v46, %v1209_v45  ;;  %1304 = vrot.lane.b32.xlu0 %v1295_v44, %s2247_s4 }
0x1037   :  { %v1220_v49 = vadd.f32 %v1219_v47, %v1214_v48 }
0x1039   :  { %1297 = vrot.lane.b32.xlu1 %v1220_v49, %s2247_s4 }
0x10a7   :  { %v1305_v50 = vpop.permute.xlu0 %1304 }
0x10a8   :  { %v1307_v51 = vsel %vm636_vm9, %v1305_v50, 0.0  ;;  %v2693_v52 = vsel %vm636_vm9, %v1305_v50, %v2645_v60  ;;  %v2072_v60 = vld [vmem:[#allocation10 + $0x18] sm:$0xff]  }
0x10a9   :  { %1309 = vst.msk [vmem:[#allocation13 + $0x8] sm:$0xf] %vm457_vm4, %v1307_v51  ;;  %v1389_v53 = vpack.c.bf16 %v2693_v52, %v2693_v52 }
0x10ab   :  { %1931 = vmatmul.mubr.msk.bf16.vlgmr.msra.gmra.mrb[28].mxu1 %vm119_vm0, %v1389_v53  ;;  %v1298_v54 = vpop.permute.xlu1 %1297 }
0x10ac   :  { %v1300_v55 = vsel %vm637_vm8, %v1298_v54, 0.0  ;;  %v2704_v56 = vsel %vm637_vm8, %v1298_v54, %v2656_v1  ;;  %1943 = vmatpush3.bf16.msra.mxu1 %v2070_v57  ;;  %1946 = vmatprep.mubr.msk.bf16.mxu1 %vm2245_vm1, %v2244_v7 }
0x10ad   :  { %1302 = vst.msk [vmem:[#allocation12 + $0x14] sm:$0xf] %vm457_vm4, %v1300_v55  ;;  %v1314_v58 = vpack.c.bf16 %v2704_v56, %v2704_v56  ;;  %1944 = vmatprep.subr.bf16.mxu1 %v2244_v7 }
0x10af   :  { %1923 = vmatmul.mubr.msk.bf16.vlgmr.msra.gmra.mrb[28].mxu0 %vm119_vm0, %v1314_v58 }
0x10b0   :  { %1935 = vmatpush3.bf16.msra.mxu0 %v2071_v59  ;;  %1945 = vmatpush3.bf16.msra.mxu1 %v2072_v60 }
0x10b1   :  { %1936 = vmatprep.subr.bf16.mxu0 %v2244_v7  ;;  %1938 = vmatprep.mubr.msk.bf16.mxu0 %vm2245_vm1, %v2244_v7 }
0x10b4   :  { %1937 = vmatpush3.bf16.msra.mxu0 %v2073_v61 }
0x117e   :  { %v1427_v62 = vpop.f32.mrb[28].mxu1 }
0x117f   :  { %v1932_v63 = vpop.f32.mrb[29].mxu1  ;;  %v1440_v1 = vadd.f32 %v1427_v62, %v2420_v17  ;;  %v1433_v7 = vadd.f32 %v1427_v62, %v1313_v4 }
0x1180   :  { %v1430_v0 = vpop.f32.mrb[30].mxu1  ;;  %v1481_v63 = vld [vmem:[#allocation3] sm:$0xf] }
0x1181   :  { %1442 = vrot.lane.b32.xlu0 %v1440_v1, %s2240_s1  ;;  %v1933_v6 = vpop.f32.mrb[31].mxu1  ;;  %v1745_v12 = vmul.f32 -1.442695, %v1433_v7  ;;  %v1480_v0 = vld [vmem:[#allocation2 + $0x1c] sm:$0xf] }
0x1182   :  { %v1352_v2 = vpop.f32.mrb[28].mxu0 }
0x1183   :  { %v1924_v3 = vpop.f32.mrb[29].mxu0  ;;  %v1365_v5 = vadd.f32 %v1352_v2, %v2430_v34  ;;  %v1358_v14 = vadd.f32 %v1352_v2, %v1312_v10  ;;  %2046 = vpow2.f32 %v1745_v12 }
0x1184   :  { %v1355_v8 = vpop.f32.mrb[30].mxu0 }
0x1185   :  { %1367 = vrot.lane.b32.xlu1 %v1365_v5, %s2240_s1  ;;  %v1925_v9 = vpop.f32.mrb[31].mxu0  ;;  %v1743_v13 = vmul.f32 -1.442695, %v1358_v14 }
0x1187   :  { %2048 = vpow2.f32 %v1743_v13 }
0x118d   :  { %v2047_v11 = vpop.eup %2046 }
0x118e   :  { %v1437_v15 = vadd.f32 1.0, %v2047_v11 }
0x1190   :  { %2050 = vrcp.f32 %v1437_v15 }
0x1191   :  { %v2049_v16 = vpop.eup %2048 }
0x1192   :  { %v1362_v19 = vadd.f32 1.0, %v2049_v16 }
0x1194   :  { %2052 = vrcp.f32 %v1362_v19 }
0x119a   :  { %v2051_v20 = vpop.eup %2050 }
0x119b   :  { %v1452_v33 = vsub.f32 1.0, %v2051_v20 }
0x119e   :  { %v2053_v23 = vpop.eup %2052 }
0x119f   :  { %v1377_v40 = vsub.f32 1.0, %v2053_v23 }
0x11f3   :  { %v1443_v21 = vpop.permute.xlu0 %1442 }
0x11f4   :  { %v1445_v22 = vmul.f32 %v2051_v20, %v1443_v21 }
0x11f6   :  { %1447 = vrot.lane.b32.xlu0 %v1445_v22, %s2240_s1 }
0x11f7   :  { %v1368_v24 = vpop.permute.xlu1 %1367 }
0x11f8   :  { %v1370_v25 = vmul.f32 %v2053_v23, %v1368_v24 }
0x11fa   :  { %1372 = vrot.lane.b32.xlu1 %v1370_v25, %s2240_s1 }
0x11fe   :  { %1459 = vrot.lane.b32.xlu1 %v2693_v52, %s2248_s16 }
0x1202   :  { %1384 = vrot.lane.b32.xlu1 %v2704_v56, %s2248_s16 }
0x1268   :  { %v1448_v26 = vpop.permute.xlu0 %1447 }
0x1269   :  { %v1450_v27 = vadd.f32 %v1448_v26, %v1313_v4 }
0x126b   :  { %2054 = vtanh.f32 %v1450_v27 }
0x126c   :  { %v1373_v28 = vpop.permute.xlu1 %1372 }
0x126d   :  { %v1375_v29 = vadd.f32 %v1373_v28, %v1312_v10 }
0x126f   :  { %2056 = vtanh.f32 %v1375_v29 }
0x1270   :  { %v1460_v32 = vpop.permute.xlu1 %1459 }
0x1271   :  { %v1462_v36 = vmul.f32 %v2051_v20, %v1460_v32 }
0x1274   :  { %v1385_v38 = vpop.permute.xlu1 %1384 }
0x1275   :  { %v2055_v30 = vpop.eup %2054  ;;  %v1387_v42 = vmul.f32 %v2053_v23, %v1385_v38 }
0x1276   :  { %1454 = vrot.lane.b32.xlu0 %v2055_v30, %s2247_s4 }
0x1279   :  { %v2057_v31 = vpop.eup %2056 }
0x127a   :  { %1379 = vrot.lane.b32.xlu0 %v2057_v31, %s2247_s4 }
0x12e8   :  { %v1455_v35 = vpop.permute.xlu0 %1454 }
0x12e9   :  { %v1457_v37 = vmul.f32 %v1455_v35, %v1452_v33 }
0x12eb   :  { %v1463_v39 = vadd.f32 %v1462_v36, %v1457_v37 }
0x12ec   :  { %v1380_v41 = vpop.permute.xlu0 %1379 }
0x12ed   :  { %v1382_v43 = vmul.f32 %v1380_v41, %v1377_v40  ;;  %1472 = vrot.lane.b32.xlu0 %v1463_v39, %s2247_s4 }
0x12ef   :  { %v1388_v44 = vadd.f32 %v1387_v42, %v1382_v43 }
0x12f1   :  { %1465 = vrot.lane.b32.xlu1 %v1388_v44, %s2247_s4 }
0x135f   :  { %v1473_v45 = vpop.permute.xlu0 %1472 }
0x1360   :  { %v1475_v46 = vsel %vm466_vm7, %v1473_v45, 0.0  ;;  %v2735_v47 = vsel %vm466_vm7, %v1473_v45, %v2693_v52 }
0x1361   :  { %1477 = vst.msk [vmem:[#allocation13 + $0x4] sm:$0xf] %vm457_vm4, %v1475_v46  ;;  %v1557_v48 = vpack.c.bf16 %v2735_v47, %v2735_v47 }
0x1363   :  { %1947 = vmatmul.mubr.msk.bf16.vlgmr.msra.gmra.mrb[32].mxu1 %vm119_vm0, %v1557_v48  ;;  %v1466_v49 = vpop.permute.xlu1 %1465 }
0x1364   :  { %v1468_v50 = vsel %vm467_vm6, %v1466_v49, 0.0  ;;  %v2746_v51 = vsel %vm467_vm6, %v1466_v49, %v2704_v56 }
0x1365   :  { %1470 = vst.msk [vmem:[#allocation12 + $0x18] sm:$0xf] %vm457_vm4, %v1468_v50  ;;  %v1482_v52 = vpack.c.bf16 %v2746_v51, %v2746_v51 }
0x1367   :  { %1939 = vmatmul.mubr.msk.bf16.vlgmr.msra.gmra.mrb[32].mxu0 %vm119_vm0, %v1482_v52 }
0x1436   :  { %v1595_v53 = vpop.f32.mrb[32].mxu1 }
0x1437   :  { %v1948_v54 = vpop.f32.mrb[33].mxu1  ;;  %v1608_v55 = vadd.f32 %v1595_v53, %v2420_v17  ;;  %v1601_v1 = vadd.f32 %v1595_v53, %v1481_v63 }
0x1438   :  { %v1598_v57 = vpop.f32.mrb[34].mxu1 }
0x1439   :  { %1610 = vrot.lane.b32.xlu0 %v1608_v55, %s2240_s1  ;;  %v1949_v58 = vpop.f32.mrb[35].mxu1  ;;  %v1749_v6 = vmul.f32 -1.442695, %v1601_v1 }
0x143a   :  { %v1520_v59 = vpop.f32.mrb[32].mxu0 }
0x143b   :  { %v1940_v60 = vpop.f32.mrb[33].mxu0  ;;  %v1533_v56 = vadd.f32 %v1520_v59, %v2430_v34  ;;  %v1526_v2 = vadd.f32 %v1520_v59, %v1480_v0  ;;  %2058 = vpow2.f32 %v1749_v6 }
0x143c   :  { %v1523_v61 = vpop.f32.mrb[34].mxu0 }
0x143d   :  { %1535 = vrot.lane.b32.xlu1 %v1533_v56, %s2240_s1  ;;  %v1941_v62 = vpop.f32.mrb[35].mxu0  ;;  %v1747_v3 = vmul.f32 -1.442695, %v1526_v2 }
0x143f   :  { %2060 = vpow2.f32 %v1747_v3 }
0x1445   :  { %v2059_v17 = vpop.eup %2058 }
0x1446   :  { %v1605_v5 = vadd.f32 1.0, %v2059_v17 }
0x1448   :  { %2062 = vrcp.f32 %v1605_v5 }
0x1449   :  { %v2061_v8 = vpop.eup %2060 }
0x144a   :  { %v1530_v9 = vadd.f32 1.0, %v2061_v8 }
0x144c   :  { %2064 = vrcp.f32 %v1530_v9 }
0x1452   :  { %v2063_v4 = vpop.eup %2062 }
0x1453   :  { %v1620_v22 = vsub.f32 1.0, %v2063_v4 }
0x1456   :  { %v2065_v10 = vpop.eup %2064 }
0x1457   :  { %v1545_v28 = vsub.f32 1.0, %v2065_v10 }
0x14ab   :  { %v1611_v34 = vpop.permute.xlu0 %1610 }
0x14ac   :  { %v1613_v7 = vmul.f32 %v2063_v4, %v1611_v34 }
0x14ae   :  { %1615 = vrot.lane.b32.xlu0 %v1613_v7, %s2240_s1 }
0x14af   :  { %v1536_v12 = vpop.permute.xlu1 %1535 }
0x14b0   :  { %v1538_v14 = vmul.f32 %v2065_v10, %v1536_v12 }
0x14b2   :  { %1540 = vrot.lane.b32.xlu1 %v1538_v14, %s2240_s1 }
0x14b6   :  { %1627 = vrot.lane.b32.xlu1 %v2735_v47, %s2248_s16 }
0x14ba   :  { %1552 = vrot.lane.b32.xlu1 %v2746_v51, %s2248_s16 }
0x1520   :  { %v1616_v13 = vpop.permute.xlu0 %1615 }
0x1521   :  { %v1618_v11 = vadd.f32 %v1616_v13, %v1481_v63 }
0x1523   :  { %2066 = vtanh.f32 %v1618_v11 }
0x1524   :  { %v1541_v15 = vpop.permute.xlu1 %1540 }
0x1525   :  { %v1543_v16 = vadd.f32 %v1541_v15, %v1480_v0 }
0x1527   :  { %2068 = vtanh.f32 %v1543_v16 }
0x1528   :  { %v1628_v21 = vpop.permute.xlu1 %1627 }
0x1529   :  { %v1630_v24 = vmul.f32 %v2063_v4, %v1628_v21 }
0x152c   :  { %v1553_v26 = vpop.permute.xlu1 %1552 }
0x152d   :  { %v2067_v19 = vpop.eup %2066  ;;  %v1555_v30 = vmul.f32 %v2065_v10, %v1553_v26 }
0x152e   :  { %1622 = vrot.lane.b32.xlu0 %v2067_v19, %s2247_s4 }
0x1531   :  { %v2069_v20 = vpop.eup %2068 }
0x1532   :  { %1547 = vrot.lane.b32.xlu0 %v2069_v20, %s2247_s4 }
0x15a0   :  { %v1623_v23 = vpop.permute.xlu0 %1622 }
0x15a1   :  { %v1625_v25 = vmul.f32 %v1623_v23, %v1620_v22 }
0x15a3   :  { %v1631_v27 = vadd.f32 %v1630_v24, %v1625_v25 }
0x15a4   :  { %v1548_v29 = vpop.permute.xlu0 %1547 }
0x15a5   :  { %v1550_v31 = vmul.f32 %v1548_v29, %v1545_v28  ;;  %1640 = vrot.lane.b32.xlu0 %v1631_v27, %s2247_s4 }
0x15a7   :  { %v1556_v32 = vadd.f32 %v1555_v30, %v1550_v31 }
0x15a9   :  { %1633 = vrot.lane.b32.xlu1 %v1556_v32, %s2247_s4 }
0x1617   :  { %v1641_v33 = vpop.permute.xlu0 %1640 }
0x1618   :  { %v1643_v35 = vsel %vm271_vm5, %v1641_v33, 0.0  ;;  %v1646_v36 = vsel %vm271_vm5, %v1641_v33, %v2735_v47 }
0x1619   :  { %1644 = vst.msk [vmem:[#allocation13] sm:$0xf] %vm457_vm4, %v1643_v35  ;;  %1649 = vst.msk [vmem:[#allocation15 + $0x4] sm:$0xf] %vm457_vm4, %v1646_v36 }
0x161a   :  { %2173 = shalt.err (!%p2170_p8)
}
0x161b   :  { %s2174_s24 = scalar_lea.hbm %s2839_s7, 512 }
0x161c   :  { %p2175_p9 = scmp.ne.s32.totalorder %s2839_s7, %s2174_s24  ;;  %p2178_p10 = scmp.lt.u32.totalorder %s2174_s24, %s2839_s7 }
0x161e   :  { %p2180_p11 = pnand %p2178_p10, %p2175_p9 }
0x1620   :  { %2183 = shalt.err (!%p2180_p11)
}
0x1621   :  { %1673 = dma.vmem_to_hbm [thread:$0]  %s1668_s18, 512, %s2839_s7, [#allocation14], %s2240_s1, %s2240_s1, %s2241_s27   ;;  %v1634_v37 = vpop.permute.xlu1 %1633 }
0x1622   :  { %v1636_v38 = vsel %vm272_vm3, %v1634_v37, 0.0  ;;  %v1645_v39 = vsel %vm272_vm3, %v1634_v37, %v2746_v51  ;;  %s2184_s3 = scalar_lea.vmem %s1656_s0, 512  ;;  %p2189_p13 = scmp.lt.s32.totalorder %s1656_s0, %s1656_s0 }
0x1623   :  { %1638 = vst.msk [vmem:[#allocation12 + $0x1c] sm:$0xf] %vm457_vm4, %v1636_v38  ;;  %1647 = vst.msk [vmem:[#allocation15] sm:$0xf] %vm457_vm4, %v1645_v39  ;;  %p2185_p12 = scmp.ne.s32.totalorder %s1656_s0, %s2184_s3  ;;  %p2190_p0 = scmp.lt.s32.totalorder %s2184_s3, %s2184_s3 }
0x1625   :  { %p2191_p1 = por %p2190_p0, %p2189_p13 }
0x1627   :  { %p2192_p2 = pnand %p2191_p1, %p2185_p12 }
0x1629   :  { %2195 = shalt.err (!%p2192_p2)
}
0x162a   :  { %s2196_s11 = scalar_lea.hbm %s2838_s6, 512 }
0x162b   :  { %p2197_p3 = scmp.ne.s32.totalorder %s2838_s6, %s2196_s11  ;;  %p2200_p4 = scmp.lt.u32.totalorder %s2196_s11, %s2838_s6 }
0x162d   :  { %p2202_p5 = pnand %p2200_p4, %p2197_p3 }
0x162f   :  { %2205 = shalt.err (!%p2202_p5)
}
0x1630   :  { %1661 = dma.vmem_to_hbm [thread:$0]  %s1656_s0, 512, %s2838_s6, [#allocation6], %s2240_s1, %s2240_s1, %s2241_s27  }
0x1631   :  { %s2206_s16 = scalar_lea.vmem %s2793_s20, 128  ;;  %p2211_p7 = scmp.lt.s32.totalorder %s2793_s20, %s2793_s20 }
0x1632   :  { %p2207_p6 = scmp.ne.s32.totalorder %s2793_s20, %s2206_s16  ;;  %p2212_p8 = scmp.lt.s32.totalorder %s2206_s16, %s2206_s16 }
0x1634   :  { %p2213_p9 = por %p2212_p8, %p2211_p7 }
0x1636   :  { %p2214_p10 = pnand %p2213_p9, %p2207_p6 }
0x1638   :  { %2217 = shalt.err (!%p2214_p10)
}
0x1639   :  { %s2218_s19 = scalar_lea.hbm %s2840_s8, 128 }
0x163a   :  { %p2219_p11 = scmp.ne.s32.totalorder %s2840_s8, %s2218_s19  ;;  %p2222_p12 = scmp.lt.u32.totalorder %s2218_s19, %s2840_s8 }
0x163c   :  { %p2224_p13 = pnand %p2222_p12, %p2219_p11 }
0x163e   :  { %2227 = shalt.err (!%p2224_p13)
}
0x163f   :  { %1685 = dma.vmem_to_hbm [thread:$0]  %s2793_s20, 128, %s2840_s8, [#allocation14], %s2240_s1, %s2240_s1, %s2241_s27  }
0x1640   :  { %2234 = dma.done.wait [#allocation6], 512  }
0x1641   :  { %2235 = vsyncadd [#allocation6], 4294966784 }
0x1642   :  { %2236 = dma.done.wait [#allocation14], 640  }
0x1643   :  { %2237 = vsyncadd [#allocation14], 4294966656 }
0x1644   :  { %1695 = vsyncpa [#allocation5], 1 }
0x1645   :  { %1696 = vsyncpa [#allocation8], 1 }
0x1646   :  { %1697 = vsyncpa [#allocation11], 1 }
0x1647   :  { %1698 = vsyncpa [#allocation6], 1 }
0x1648   :  { %1699 = vsyncpa [#allocation14], 1 }

</bundles_post_ra>
